<compile_context>
chip_gen: v7x
topology: tpu7x:2x2x1
jax: 0.10.0
libtpu: 0.0.40
codegen_flags: <defaults>
</compile_context>

<pallas_src>
import numpy as np

import jax
import jax.numpy as jnp
from jax.experimental import pallas as pl
from jax.experimental.pallas import tpu as pltpu


# ---------------------------------------------------------------------------
# Processor configs (from the HF processor configs; output spatial sizes
# shrunk for this small synthetic example).
# ---------------------------------------------------------------------------
VIT_OUT_SIZE = 16        # real processor: 224
BLIP_OUT_SIZE = 24       # real processor: 384
VIT_MEAN = np.array([0.5, 0.5, 0.5], np.float32)
VIT_STD = np.array([0.5, 0.5, 0.5], np.float32)
BLIP_MEAN = np.array([0.48145466, 0.4578275, 0.40821073], np.float32)
BLIP_STD = np.array([0.26862954, 0.26130258, 0.27577711], np.float32)

LANE = 128     # MXU / lane granule (all TPU generations)
SUBLANE = 8    # sublane granule

# Flipped to False (and jit caches cleared) if this Pallas build rejects
# pipeline_mode=pl.Buffered(1) on pallas_call BlockSpecs.
_SINGLE_BUFFER_CONSTS = True


def _round_up(x: int, m: int) -> int:
    return (x + m - 1) // m * m


# ---------------------------------------------------------------------------
# Host-side constant builders.
# ---------------------------------------------------------------------------
def _bilinear_matrix(out_size: int, in_size: int) -> np.ndarray:
    """Half-pixel bilinear interpolation along one axis as a (out, in) matrix."""
    out_idx = np.arange(out_size, dtype=np.float32)
    src = (out_idx + 0.5) * (in_size / out_size) - 0.5
    src = np.clip(src, 0.0, in_size - 1)
    lo = np.floor(src).astype(np.int32)
    hi = np.minimum(lo + 1, in_size - 1)
    w_hi = src - lo.astype(np.float32)
    w_lo = 1.0 - w_hi
    M = np.zeros((out_size, in_size), dtype=np.float32)
    M[np.arange(out_size), lo] += w_lo
    M[np.arange(out_size), hi] += w_hi
    return M


def _per_channel_w_matrices(out_size: int, w_in: int, w_pad: int,
                            channels: int, std: np.ndarray) -> np.ndarray:
    """(C, w_pad, out_size) W-resize matrices acting on the interleaved
    (w*C + c) lane axis, with the 1/255 rescale and 1/std normalization folded
    into the columns.  Rows beyond w_in*C are zero (they meet the zero-padded
    x lanes)."""
    R = _bilinear_matrix(out_size, w_in)                     # (out, w_in)
    M = np.zeros((channels, w_pad, out_size), np.float32)
    for c in range(channels):
        M[c, c:w_in * channels:channels, :] = R.T / (255.0 * std[c])
    return M


def _const_spec(block_shape):
    """BlockSpec for a grid-invariant constant (block index 0 every step).

    Single-buffered when supported: the default double buffer would be a
    useless second VMEM copy of the resize matrices (biggest VMEM item at
    production sizes, esp. under v7x's 64 MiB per-core VMEM)."""
    index_map = lambda n: (0,) * len(block_shape)
    if _SINGLE_BUFFER_CONSTS and hasattr(pl, "Buffered"):
        try:
            return pl.BlockSpec(block_shape, index_map,
                                pipeline_mode=pl.Buffered(1))
        except Exception:
            pass
    return pl.BlockSpec(block_shape, index_map)


# ---------------------------------------------------------------------------
# Fused Pallas kernel: one image per grid point, both processors at once,
# NCHW written directly.
# ---------------------------------------------------------------------------
def fused_image_processor(images_nhwc: jnp.ndarray):
    """NHWC uint8 -> (vit NCHW f32, blip NCHW f32) pixel_values.

    Per image:
        y       = L @ x                       shared bf16 H-resize  (HL, Wp)
        out[c]  = y_part @ RC[c] + bias[c]    per-channel W-resize -> NCHW plane
    with 1/255 and 1/std folded into RC and -mean/std a scalar bias baked into
    the kernel, so the epilogue is a single scalar add per plane.
    """
    N, H_in, W_in, C = images_nhwc.shape
    Hv = Wv = VIT_OUT_SIZE
    Hb = Wb = BLIP_OUT_SIZE

    # Keep the ViT/BLIP split of the shared H-resize sublane-aligned so the
    # y[:Hv_pad] / y[Hv_pad:] slices never force a VMEM copy (guard rail).
    Hv_pad = _round_up(Hv, SUBLANE)
    HL = Hv_pad + Hb

    # Pad the channel-interleaved lane axis (w*C + c) to a multiple of 128 so
    # both matmuls contract over full MXU lanes; padded lanes are zero and meet
    # zero RC rows.  H_in (K of the first matmul) only needs sublane alignment.
    WC = W_in * C
    Wp = _round_up(WC, LANE)

    # Host-side constants, shipped as bf16 (pixel values 0..255 are exact in
    # bf16; interpolation-weight rounding ~0.4% rel; accumulation stays f32).
    l_cat = np.zeros((HL, H_in), np.float32)
    l_cat[:Hv] = _bilinear_matrix(Hv, H_in)
    l_cat[Hv_pad:] = _bilinear_matrix(Hb, H_in)
    rc_vit = _per_channel_w_matrices(Wv, W_in, Wp, C, VIT_STD)    # (C, Wp, Wv)
    rc_blip = _per_channel_w_matrices(Wb, W_in, Wp, C, BLIP_STD)  # (C, Wp, Wb)
    vit_bias = tuple(float(v) for v in (-VIT_MEAN / VIT_STD))
    blip_bias = tuple(float(v) for v in (-BLIP_MEAN / BLIP_STD))

    def kernel(x_ref, l_ref, rcv_ref, rcb_ref, vit_ref, blip_ref):
        # uint8 -> bf16 on the VPU after the cheap uint8 DMA (0..255 exact).
        x = x_ref[0].astype(jnp.bfloat16)                          # (H_in, Wp)
        # Shared H-resize for both processors: bf16 MXU, f32 accumulation.
        y = jnp.dot(l_ref[...], x, preferred_element_type=jnp.float32)
        yv = y[:Hv_pad].astype(jnp.bfloat16)                       # (Hv_pad, Wp)
        yb = y[Hv_pad:].astype(jnp.bfloat16)                       # (Hb, Wp)
        # Per-channel W-resize (1/255 and 1/std folded into RC) writes the
        # NCHW planes directly -- no post-kernel transpose pass over HBM.
        for c in range(C):                                         # static C=3
            v = jnp.dot(yv, rcv_ref[c], preferred_element_type=jnp.float32)
            vit_ref[0, c] = v[:Hv] + vit_bias[c]
            b = jnp.dot(yb, rcb_ref[c], preferred_element_type=jnp.float32)
            blip_ref[0, c] = b + blip_bias[c]

    # NHWC uint8 viewed as a lane-dense (H_in, W_in*C) slab per image (no HBM
    # transpose, no f32 cast before the kernel), zero-padded to 128 lanes.
    x_flat = images_nhwc.reshape(N, H_in, WC)
    if Wp != WC:
        x_flat = jnp.pad(x_flat, ((0, 0), (0, 0), (0, Wp - WC)))

    # Explicit VMEM budget once the working set outgrows the scoped defaults
    # (16 MiB v5e / 32 MiB v6e+v7x), i.e. at production 224/384 sizes; at toy
    # sizes the defaults are fine and left untouched.
    BF16 = 2
    const_bytes = (HL * H_in + C * Wp * (Wv + Wb)) * BF16
    io_bytes = 2 * H_in * Wp + 2 * 4 * C * (Hv * Wv + Hb * Wb)      # dbl-buffered
    tmp_bytes = HL * Wp * (4 + BF16) + H_in * Wp * BF16             # y + bf16 casts
    vmem_est = 2 * const_bytes + io_bytes + tmp_bytes
    cp_kwargs = dict(dimension_semantics=("parallel",))  # v7x: 2 TCs; serial v5e/v6e
    if vmem_est > 24 * 1024 * 1024:
        cp_kwargs["vmem_limit_bytes"] = min(int(1.5 * vmem_est), 96 * 1024 * 1024)

    vit_img, blip_img = pl.pallas_call(
        kernel,
        out_shape=(jax.ShapeDtypeStruct((N, C, Hv, Wv), jnp.float32),
                   jax.ShapeDtypeStruct((N, C, Hb, Wb), jnp.float32)),
        grid=(N,),
        in_specs=[
            pl.BlockSpec((1, H_in, Wp), lambda n: (n, 0, 0)),
            _const_spec((HL, H_in)),       # shared H-resize matrix
            _const_spec((C, Wp, Wv)),      # ViT per-channel W-resize (+ scale)
            _const_spec((C, Wp, Wb)),      # BLIP per-channel W-resize (+ scale)
        ],
        out_specs=(
            pl.BlockSpec((1, C, Hv, Wv), lambda n: (n, 0, 0, 0)),
            pl.BlockSpec((1, C, Hb, Wb), lambda n: (n, 0, 0, 0)),
        ),
        compiler_params=pltpu.CompilerParams(**cp_kwargs),
    )(x_flat,
      jnp.asarray(l_cat, jnp.bfloat16),
      jnp.asarray(rc_vit, jnp.bfloat16),
      jnp.asarray(rc_blip, jnp.bfloat16))

    return vit_img, blip_img


# ---------------------------------------------------------------------------
# Forward mirroring DataProcessor.forward.
# ---------------------------------------------------------------------------
@jax.jit
def data_processor_forward(images_nhwc, blip_txt, bert_txt, labels):
    """images_nhwc: (N, H, W, 3) uint8 RGB; blip_txt / bert_txt: (ids, mask)."""
    vit_img, blip_img = fused_image_processor(images_nhwc)

    # TODO(synk): tokenization (string -> ids) has no Pallas equivalent; token
    # ids / attention masks are passed through unchanged.
    blip_tokens, blip_attn = blip_txt
    bert_tokens, bert_attn = bert_txt

    label = jnp.asarray(labels, jnp.float32).reshape(-1, 1)  # unsqueeze(-1).float()

    return (vit_img, blip_img, (blip_tokens, blip_attn),
            (bert_tokens, bert_attn), label)


if __name__ == "__main__":
    key = jax.random.PRNGKey(0)
    k_img, k_blip, k_bert = jax.random.split(key, 3)

    N, H, W, C = 2, 32, 32, 3
    images = jax.random.randint(k_img, (N, H, W, C), 0, 256,
                                dtype=jnp.int32).astype(jnp.uint8)

    seq = 8
    blip_tokens = jax.random.randint(k_blip, (N, seq), 0, 30522, dtype=jnp.int32)
    bert_tokens = jax.random.randint(k_bert, (N, seq), 0, 30522, dtype=jnp.int32)
    blip_attn = jnp.ones((N, seq), jnp.int32)
    bert_attn = jnp.ones((N, seq), jnp.int32)
    labels = jnp.array([1, 0], jnp.int32)

    def _run():
        return jax.block_until_ready(
            data_processor_forward(images, (blip_tokens, blip_attn),
                                   (bert_tokens, bert_attn), labels))

    try:
        out = _run()
    except Exception:
        # Defensive fallback: if this Pallas build rejects single-buffered
        # constants (pipeline_mode=pl.Buffered(1)), retry with the default
        # double-buffered pipeline -- identical numerics.
        _SINGLE_BUFFER_CONSTS = False
        jax.clear_caches()
        out = _run()

    vit_img, blip_img, (bt, ba), (nt, na), lbl = out
    assert vit_img.shape == (N, 3, VIT_OUT_SIZE, VIT_OUT_SIZE)
    assert vit_img.dtype == jnp.float32
    assert blip_img.shape == (N, 3, BLIP_OUT_SIZE, BLIP_OUT_SIZE)
    assert blip_img.dtype == jnp.float32
    assert lbl.shape == (N, 1) and lbl.dtype == jnp.float32

    # Numerical check against a pure numpy f32 reference of the same
    # resize -> rescale -> normalize pipeline.  Tolerance reflects bf16
    # rounding of the interpolation weights / intermediates (~1% of the
    # normalized output range); accumulation inside the kernel is f32.
    img_np = np.asarray(images).astype(np.float32)

    def _ref(out_size, mean, std):
        L = _bilinear_matrix(out_size, H)
        R = _bilinear_matrix(out_size, W)
        r = np.einsum('ih,nhwc,jw->ncij', L, img_np, R)
        return (r / 255.0 - mean.reshape(1, 3, 1, 1)) / std.reshape(1, 3, 1, 1)

    np.testing.assert_allclose(np.asarray(vit_img),
                               _ref(VIT_OUT_SIZE, VIT_MEAN, VIT_STD),
                               atol=5e-2, rtol=2e-2)
    np.testing.assert_allclose(np.asarray(blip_img),
                               _ref(BLIP_OUT_SIZE, BLIP_MEAN, BLIP_STD),
                               atol=5e-2, rtol=2e-2)

    print("KERNEL_OK")
</pallas_src>

<mosaic_0001>
module attributes {stable_mosaic.version = 11 : i64} {
  func.func @kernel(%arg0: i32, %arg1: memref<1x32x128xi8, #tpu.memory_space<vmem>>, %arg2: memref<40x32xbf16, #tpu.memory_space<vmem>>, %arg3: memref<3x128x16xbf16, #tpu.memory_space<vmem>>, %arg4: memref<3x128x24xbf16, #tpu.memory_space<vmem>>, %arg5: memref<1x3x16x16xf32, #tpu.memory_space<vmem>>, %arg6: memref<1x3x24x24xf32, #tpu.memory_space<vmem>>) attributes {dimension_semantics = [#tpu.dimension_semantics<parallel>], iteration_bounds = array<i64: 2>, scalar_prefetch = 0 : i64, scratch_operands = 0 : i64, tpu.core_type = #tpu.core_type<tc>, window_params = [{transform_indices = @transform_0, window_bounds = array<i64: 1, 32, 128>}, {pipeline_mode = #tpu.pipeline_mode<synchronous>, transform_indices = @transform_1, window_bounds = array<i64: 40, 32>}, {pipeline_mode = #tpu.pipeline_mode<synchronous>, transform_indices = @transform_2, window_bounds = array<i64: 3, 128, 16>}, {pipeline_mode = #tpu.pipeline_mode<synchronous>, transform_indices = @transform_3, window_bounds = array<i64: 3, 128, 24>}, {transform_indices = @transform_4, window_bounds = array<i64: 1, 3, 16, 16>}, {transform_indices = @transform_5, window_bounds = array<i64: 1, 3, 24, 24>}]} {
    %c0 = arith.constant 0 : index
    %c0_0 = arith.constant 0 : index
    %c0_1 = arith.constant 0 : index
    %0 = vector.load %arg1[%c0, %c0_0, %c0_1] : memref<1x32x128xi8, #tpu.memory_space<vmem>>, vector<1x32x128xi8>
    %1 = vector.shape_cast %0 : vector<1x32x128xi8> to vector<32x128xi8>
    %2 = arith.uitofp %1 : vector<32x128xi8> to vector<32x128xbf16>
    %c0_2 = arith.constant 0 : index
    %c0_3 = arith.constant 0 : index
    %3 = vector.load %arg2[%c0_2, %c0_3] : memref<40x32xbf16, #tpu.memory_space<vmem>>, vector<40x32xbf16>
    %cst = arith.constant dense<0.000000e+00> : vector<40x128xf32>
    %4 = tpu.matmul %3, %2, %cst {dimension_numbers = #tpu.dot_dimension_numbers<[1], [0], [0], [1], [0, 0, 1, 1], [], []>} : vector<40x32xbf16>, vector<32x128xbf16>, vector<40x128xf32> -> vector<40x128xf32>
    %5 = vector.extract_strided_slice %4 {offsets = [0, 0], sizes = [16, 128], strides = [1, 1]} : vector<40x128xf32> to vector<16x128xf32>
    %6 = arith.truncf %5 : vector<16x128xf32> to vector<16x128xbf16>
    %7 = vector.extract_strided_slice %4 {offsets = [16, 0], sizes = [24, 128], strides = [1, 1]} : vector<40x128xf32> to vector<24x128xf32>
    %8 = arith.truncf %7 : vector<24x128xf32> to vector<24x128xbf16>
    %c0_4 = arith.constant 0 : index
    %c0_5 = arith.constant 0 : index
    %c0_6 = arith.constant 0 : index
    %9 = vector.load %arg3[%c0_4, %c0_5, %c0_6] : memref<3x128x16xbf16, #tpu.memory_space<vmem>>, vector<1x128x16xbf16>
    %10 = vector.shape_cast %9 : vector<1x128x16xbf16> to vector<128x16xbf16>
    %cst_7 = arith.constant dense<0.000000e+00> : vector<16x16xf32>
    %11 = tpu.matmul %6, %10, %cst_7 {dimension_numbers = #tpu.dot_dimension_numbers<[1], [0], [0], [1], [0, 0, 1, 1], [], []>} : vector<16x128xbf16>, vector<128x16xbf16>, vector<16x16xf32> -> vector<16x16xf32>
    %cst_8 = arith.constant -1.000000e+00 : f32
    %12 = vector.broadcast %cst_8 : f32 to vector<16x16xf32>
    %13 = arith.addf %11, %12 : vector<16x16xf32>
    %c0_9 = arith.constant 0 : index
    %c0_10 = arith.constant 0 : index
    %c0_11 = arith.constant 0 : index
    %c0_12 = arith.constant 0 : index
    %14 = vector.load %arg5[%c0_9, %c0_10, %c0_11, %c0_12] : memref<1x3x16x16xf32, #tpu.memory_space<vmem>>, vector<1x1x16x16xf32>
    %15 = vector.shape_cast %14 : vector<1x1x16x16xf32> to vector<16x16xf32>
    %16 = vector.shape_cast %13 : vector<16x16xf32> to vector<1x1x16x16xf32>
    tpu.vector_store %arg5[%c0_9, %c0_10, %c0_11, %c0_12], %16 {strides = array<i32>} : memref<1x3x16x16xf32, #tpu.memory_space<vmem>>, vector<1x1x16x16xf32>,
    %c0_13 = arith.constant 0 : index
    %c0_14 = arith.constant 0 : index
    %c0_15 = arith.constant 0 : index
    %17 = vector.load %arg4[%c0_13, %c0_14, %c0_15] : memref<3x128x24xbf16, #tpu.memory_space<vmem>>, vector<1x128x24xbf16>
    %18 = vector.shape_cast %17 : vector<1x128x24xbf16> to vector<128x24xbf16>
    %cst_16 = arith.constant dense<0.000000e+00> : vector<24x24xf32>
    %19 = tpu.matmul %8, %18, %cst_16 {dimension_numbers = #tpu.dot_dimension_numbers<[1], [0], [0], [1], [0, 0, 1, 1], [], []>} : vector<24x128xbf16>, vector<128x24xbf16>, vector<24x24xf32> -> vector<24x24xf32>
    %cst_17 = arith.constant -1.79226255 : f32
    %20 = vector.broadcast %cst_17 : f32 to vector<24x24xf32>
    %21 = arith.addf %19, %20 : vector<24x24xf32>
    %c0_18 = arith.constant 0 : index
    %c0_19 = arith.constant 0 : index
    %c0_20 = arith.constant 0 : index
    %c0_21 = arith.constant 0 : index
    %22 = vector.load %arg6[%c0_18, %c0_19, %c0_20, %c0_21] : memref<1x3x24x24xf32, #tpu.memory_space<vmem>>, vector<1x1x24x24xf32>
    %23 = vector.shape_cast %22 : vector<1x1x24x24xf32> to vector<24x24xf32>
    %24 = vector.shape_cast %21 : vector<24x24xf32> to vector<1x1x24x24xf32>
    tpu.vector_store %arg6[%c0_18, %c0_19, %c0_20, %c0_21], %24 {strides = array<i32>} : memref<1x3x24x24xf32, #tpu.memory_space<vmem>>, vector<1x1x24x24xf32>,
    %c1 = arith.constant 1 : index
    %c0_22 = arith.constant 0 : index
    %c0_23 = arith.constant 0 : index
    %25 = vector.load %arg3[%c1, %c0_22, %c0_23] : memref<3x128x16xbf16, #tpu.memory_space<vmem>>, vector<1x128x16xbf16>
    %26 = vector.shape_cast %25 : vector<1x128x16xbf16> to vector<128x16xbf16>
    %cst_24 = arith.constant dense<0.000000e+00> : vector<16x16xf32>
    %27 = tpu.matmul %6, %26, %cst_24 {dimension_numbers = #tpu.dot_dimension_numbers<[1], [0], [0], [1], [0, 0, 1, 1], [], []>} : vector<16x128xbf16>, vector<128x16xbf16>, vector<16x16xf32> -> vector<16x16xf32>
    %cst_25 = arith.constant -1.000000e+00 : f32
    %28 = vector.broadcast %cst_25 : f32 to vector<16x16xf32>
    %29 = arith.addf %27, %28 : vector<16x16xf32>
    %c0_26 = arith.constant 0 : index
    %c1_27 = arith.constant 1 : index
    %c0_28 = arith.constant 0 : index
    %c0_29 = arith.constant 0 : index
    %30 = vector.load %arg5[%c0_26, %c1_27, %c0_28, %c0_29] : memref<1x3x16x16xf32, #tpu.memory_space<vmem>>, vector<1x1x16x16xf32>
    %31 = vector.shape_cast %30 : vector<1x1x16x16xf32> to vector<16x16xf32>
    %32 = vector.shape_cast %29 : vector<16x16xf32> to vector<1x1x16x16xf32>
    tpu.vector_store %arg5[%c0_26, %c1_27, %c0_28, %c0_29], %32 {strides = array<i32>} : memref<1x3x16x16xf32, #tpu.memory_space<vmem>>, vector<1x1x16x16xf32>,
    %c1_30 = arith.constant 1 : index
    %c0_31 = arith.constant 0 : index
    %c0_32 = arith.constant 0 : index
    %33 = vector.load %arg4[%c1_30, %c0_31, %c0_32] : memref<3x128x24xbf16, #tpu.memory_space<vmem>>, vector<1x128x24xbf16>
    %34 = vector.shape_cast %33 : vector<1x128x24xbf16> to vector<128x24xbf16>
    %cst_33 = arith.constant dense<0.000000e+00> : vector<24x24xf32>
    %35 = tpu.matmul %8, %34, %cst_33 {dimension_numbers = #tpu.dot_dimension_numbers<[1], [0], [0], [1], [0, 0, 1, 1], [], []>} : vector<24x128xbf16>, vector<128x24xbf16>, vector<24x24xf32> -> vector<24x24xf32>
    %cst_34 = arith.constant -1.75209713 : f32
    %36 = vector.broadcast %cst_34 : f32 to vector<24x24xf32>
    %37 = arith.addf %35, %36 : vector<24x24xf32>
    %c0_35 = arith.constant 0 : index
    %c1_36 = arith.constant 1 : index
    %c0_37 = arith.constant 0 : index
    %c0_38 = arith.constant 0 : index
    %38 = vector.load %arg6[%c0_35, %c1_36, %c0_37, %c0_38] : memref<1x3x24x24xf32, #tpu.memory_space<vmem>>, vector<1x1x24x24xf32>
    %39 = vector.shape_cast %38 : vector<1x1x24x24xf32> to vector<24x24xf32>
    %40 = vector.shape_cast %37 : vector<24x24xf32> to vector<1x1x24x24xf32>
    tpu.vector_store %arg6[%c0_35, %c1_36, %c0_37, %c0_38], %40 {strides = array<i32>} : memref<1x3x24x24xf32, #tpu.memory_space<vmem>>, vector<1x1x24x24xf32>,
    %c2 = arith.constant 2 : index
    %c0_39 = arith.constant 0 : index
    %c0_40 = arith.constant 0 : index
    %41 = vector.load %arg3[%c2, %c0_39, %c0_40] : memref<3x128x16xbf16, #tpu.memory_space<vmem>>, vector<1x128x16xbf16>
    %42 = vector.shape_cast %41 : vector<1x128x16xbf16> to vector<128x16xbf16>
    %cst_41 = arith.constant dense<0.000000e+00> : vector<16x16xf32>
    %43 = tpu.matmul %6, %42, %cst_41 {dimension_numbers = #tpu.dot_dimension_numbers<[1], [0], [0], [1], [0, 0, 1, 1], [], []>} : vector<16x128xbf16>, vector<128x16xbf16>, vector<16x16xf32> -> vector<16x16xf32>
    %cst_42 = arith.constant -1.000000e+00 : f32
    %44 = vector.broadcast %cst_42 : f32 to vector<16x16xf32>
    %45 = arith.addf %43, %44 : vector<16x16xf32>
    %c0_43 = arith.constant 0 : index
    %c2_44 = arith.constant 2 : index
    %c0_45 = arith.constant 0 : index
    %c0_46 = arith.constant 0 : index
    %46 = vector.load %arg5[%c0_43, %c2_44, %c0_45, %c0_46] : memref<1x3x16x16xf32, #tpu.memory_space<vmem>>, vector<1x1x16x16xf32>
    %47 = vector.shape_cast %46 : vector<1x1x16x16xf32> to vector<16x16xf32>
    %48 = vector.shape_cast %45 : vector<16x16xf32> to vector<1x1x16x16xf32>
    tpu.vector_store %arg5[%c0_43, %c2_44, %c0_45, %c0_46], %48 {strides = array<i32>} : memref<1x3x16x16xf32, #tpu.memory_space<vmem>>, vector<1x1x16x16xf32>,
    %c2_47 = arith.constant 2 : index
    %c0_48 = arith.constant 0 : index
    %c0_49 = arith.constant 0 : index
    %49 = vector.load %arg4[%c2_47, %c0_48, %c0_49] : memref<3x128x24xbf16, #tpu.memory_space<vmem>>, vector<1x128x24xbf16>
    %50 = vector.shape_cast %49 : vector<1x128x24xbf16> to vector<128x24xbf16>
    %cst_50 = arith.constant dense<0.000000e+00> : vector<24x24xf32>
    %51 = tpu.matmul %8, %50, %cst_50 {dimension_numbers = #tpu.dot_dimension_numbers<[1], [0], [0], [1], [0, 0, 1, 1], [], []>} : vector<24x128xbf16>, vector<128x24xbf16>, vector<24x24xf32> -> vector<24x24xf32>
    %cst_51 = arith.constant -1.48021984 : f32
    %52 = vector.broadcast %cst_51 : f32 to vector<24x24xf32>
    %53 = arith.addf %51, %52 : vector<24x24xf32>
    %c0_52 = arith.constant 0 : index
    %c2_53 = arith.constant 2 : index
    %c0_54 = arith.constant 0 : index
    %c0_55 = arith.constant 0 : index
    %54 = vector.load %arg6[%c0_52, %c2_53, %c0_54, %c0_55] : memref<1x3x24x24xf32, #tpu.memory_space<vmem>>, vector<1x1x24x24xf32>
    %55 = vector.shape_cast %54 : vector<1x1x24x24xf32> to vector<24x24xf32>
    %56 = vector.shape_cast %53 : vector<24x24xf32> to vector<1x1x24x24xf32>
    tpu.vector_store %arg6[%c0_52, %c2_53, %c0_54, %c0_55], %56 {strides = array<i32>} : memref<1x3x24x24xf32, #tpu.memory_space<vmem>>, vector<1x1x24x24xf32>,
    return
  }
  func.func @transform_0(%arg0: i32) -> (i32, i32, i32) {
    %c0_i32 = arith.constant 0 : i32
    %c0_i32_0 = arith.constant 0 : i32
    %c0_i32_1 = arith.constant 0 : i32
    return %arg0, %c0_i32, %c0_i32_0 : i32, i32, i32
  }
  func.func @transform_1(%arg0: i32) -> (i32, i32) {
    %c0_i32 = arith.constant 0 : i32
    %c0_i32_0 = arith.constant 0 : i32
    %c0_i32_1 = arith.constant 0 : i32
    return %c0_i32, %c0_i32_0 : i32, i32
  }
  func.func @transform_2(%arg0: i32) -> (i32, i32, i32) {
    %c0_i32 = arith.constant 0 : i32
    %c0_i32_0 = arith.constant 0 : i32
    %c0_i32_1 = arith.constant 0 : i32
    %c0_i32_2 = arith.constant 0 : i32
    return %c0_i32, %c0_i32_0, %c0_i32_1 : i32, i32, i32
  }
  func.func @transform_3(%arg0: i32) -> (i32, i32, i32) {
    %c0_i32 = arith.constant 0 : i32
    %c0_i32_0 = arith.constant 0 : i32
    %c0_i32_1 = arith.constant 0 : i32
    %c0_i32_2 = arith.constant 0 : i32
    return %c0_i32, %c0_i32_0, %c0_i32_1 : i32, i32, i32
  }
  func.func @transform_4(%arg0: i32) -> (i32, i32, i32, i32) {
    %c0_i32 = arith.constant 0 : i32
    %c0_i32_0 = arith.constant 0 : i32
    %c0_i32_1 = arith.constant 0 : i32
    %c0_i32_2 = arith.constant 0 : i32
    return %arg0, %c0_i32, %c0_i32_0, %c0_i32_1 : i32, i32, i32, i32
  }
  func.func @transform_5(%arg0: i32) -> (i32, i32, i32, i32) {
    %c0_i32 = arith.constant 0 : i32
    %c0_i32_0 = arith.constant 0 : i32
    %c0_i32_1 = arith.constant 0 : i32
    %c0_i32_2 = arith.constant 0 : i32
    return %arg0, %c0_i32, %c0_i32_0, %c0_i32_1 : i32, i32, i32, i32
  }
}

module attributes {stable_mosaic.version = 11 : i64} {
  func.func @kernel(%arg0: i32, %arg1: memref<1x32x128xi8, #tpu.memory_space<vmem>>, %arg2: memref<40x32xbf16, #tpu.memory_space<vmem>>, %arg3: memref<3x128x16xbf16, #tpu.memory_space<vmem>>, %arg4: memref<3x128x24xbf16, #tpu.memory_space<vmem>>, %arg5: memref<1x3x16x16xf32, #tpu.memory_space<vmem>>, %arg6: memref<1x3x24x24xf32, #tpu.memory_space<vmem>>) attributes {dimension_semantics = [#tpu.dimension_semantics<parallel>], iteration_bounds = array<i64: 2>, scalar_prefetch = 0 : i64, scratch_operands = 0 : i64, tpu.core_type = #tpu.core_type<tc>, window_params = [{transform_indices = @transform_0, window_bounds = array<i64: 1, 32, 128>}, {pipeline_mode = #tpu.pipeline_mode<synchronous>, transform_indices = @transform_1, window_bounds = array<i64: 40, 32>}, {pipeline_mode = #tpu.pipeline_mode<synchronous>, transform_indices = @transform_2, window_bounds = array<i64: 3, 128, 16>}, {pipeline_mode = #tpu.pipeline_mode<synchronous>, transform_indices = @transform_3, window_bounds = array<i64: 3, 128, 24>}, {transform_indices = @transform_4, window_bounds = array<i64: 1, 3, 16, 16>}, {transform_indices = @transform_5, window_bounds = array<i64: 1, 3, 24, 24>}]} {
    %c0 = arith.constant 0 : index
    %c0_0 = arith.constant 0 : index
    %c0_1 = arith.constant 0 : index
    %0 = vector.load %arg1[%c0, %c0_0, %c0_1] : memref<1x32x128xi8, #tpu.memory_space<vmem>>, vector<1x32x128xi8>
    %1 = vector.shape_cast %0 : vector<1x32x128xi8> to vector<32x128xi8>
    %2 = arith.uitofp %1 : vector<32x128xi8> to vector<32x128xbf16>
    %c0_2 = arith.constant 0 : index
    %c0_3 = arith.constant 0 : index
    %3 = vector.load %arg2[%c0_2, %c0_3] : memref<40x32xbf16, #tpu.memory_space<vmem>>, vector<40x32xbf16>
    %cst = arith.constant dense<0.000000e+00> : vector<40x128xf32>
    %4 = tpu.matmul %3, %2, %cst {dimension_numbers = #tpu.dot_dimension_numbers<[1], [0], [0], [1], [0, 0, 1, 1], [], []>} : vector<40x32xbf16>, vector<32x128xbf16>, vector<40x128xf32> -> vector<40x128xf32>
    %5 = vector.extract_strided_slice %4 {offsets = [0, 0], sizes = [16, 128], strides = [1, 1]} : vector<40x128xf32> to vector<16x128xf32>
    %6 = arith.truncf %5 : vector<16x128xf32> to vector<16x128xbf16>
    %7 = vector.extract_strided_slice %4 {offsets = [16, 0], sizes = [24, 128], strides = [1, 1]} : vector<40x128xf32> to vector<24x128xf32>
    %8 = arith.truncf %7 : vector<24x128xf32> to vector<24x128xbf16>
    %c0_4 = arith.constant 0 : index
    %c0_5 = arith.constant 0 : index
    %c0_6 = arith.constant 0 : index
    %9 = vector.load %arg3[%c0_4, %c0_5, %c0_6] : memref<3x128x16xbf16, #tpu.memory_space<vmem>>, vector<1x128x16xbf16>
    %10 = vector.shape_cast %9 : vector<1x128x16xbf16> to vector<128x16xbf16>
    %cst_7 = arith.constant dense<0.000000e+00> : vector<16x16xf32>
    %11 = tpu.matmul %6, %10, %cst_7 {dimension_numbers = #tpu.dot_dimension_numbers<[1], [0], [0], [1], [0, 0, 1, 1], [], []>} : vector<16x128xbf16>, vector<128x16xbf16>, vector<16x16xf32> -> vector<16x16xf32>
    %cst_8 = arith.constant -1.000000e+00 : f32
    %12 = vector.broadcast %cst_8 : f32 to vector<16x16xf32>
    %13 = arith.addf %11, %12 : vector<16x16xf32>
    %c0_9 = arith.constant 0 : index
    %c0_10 = arith.constant 0 : index
    %c0_11 = arith.constant 0 : index
    %c0_12 = arith.constant 0 : index
    %14 = vector.load %arg5[%c0_9, %c0_10, %c0_11, %c0_12] : memref<1x3x16x16xf32, #tpu.memory_space<vmem>>, vector<1x1x16x16xf32>
    %15 = vector.shape_cast %14 : vector<1x1x16x16xf32> to vector<16x16xf32>
    %16 = vector.shape_cast %13 : vector<16x16xf32> to vector<1x1x16x16xf32>
    tpu.vector_store %arg5[%c0_9, %c0_10, %c0_11, %c0_12], %16 {strides = array<i32>} : memref<1x3x16x16xf32, #tpu.memory_space<vmem>>, vector<1x1x16x16xf32>,
    %c0_13 = arith.constant 0 : index
    %c0_14 = arith.constant 0 : index
    %c0_15 = arith.constant 0 : index
    %17 = vector.load %arg4[%c0_13, %c0_14, %c0_15] : memref<3x128x24xbf16, #tpu.memory_space<vmem>>, vector<1x128x24xbf16>
    %18 = vector.shape_cast %17 : vector<1x128x24xbf16> to vector<128x24xbf16>
    %cst_16 = arith.constant dense<0.000000e+00> : vector<24x24xf32>
    %19 = tpu.matmul %8, %18, %cst_16 {dimension_numbers = #tpu.dot_dimension_numbers<[1], [0], [0], [1], [0, 0, 1, 1], [], []>} : vector<24x128xbf16>, vector<128x24xbf16>, vector<24x24xf32> -> vector<24x24xf32>
    %cst_17 = arith.constant -1.79226255 : f32
    %20 = vector.broadcast %cst_17 : f32 to vector<24x24xf32>
    %21 = arith.addf %19, %20 : vector<24x24xf32>
    %c0_18 = arith.constant 0 : index
    %c0_19 = arith.constant 0 : index
    %c0_20 = arith.constant 0 : index
    %c0_21 = arith.constant 0 : index
    %22 = vector.load %arg6[%c0_18, %c0_19, %c0_20, %c0_21] : memref<1x3x24x24xf32, #tpu.memory_space<vmem>>, vector<1x1x24x24xf32>
    %23 = vector.shape_cast %22 : vector<1x1x24x24xf32> to vector<24x24xf32>
    %24 = vector.shape_cast %21 : vector<24x24xf32> to vector<1x1x24x24xf32>
    tpu.vector_store %arg6[%c0_18, %c0_19, %c0_20, %c0_21], %24 {strides = array<i32>} : memref<1x3x24x24xf32, #tpu.memory_space<vmem>>, vector<1x1x24x24xf32>,
    %c1 = arith.constant 1 : index
    %c0_22 = arith.constant 0 : index
    %c0_23 = arith.constant 0 : index
    %25 = vector.load %arg3[%c1, %c0_22, %c0_23] : memref<3x128x16xbf16, #tpu.memory_space<vmem>>, vector<1x128x16xbf16>
    %26 = vector.shape_cast %25 : vector<1x128x16xbf16> to vector<128x16xbf16>
    %cst_24 = arith.constant dense<0.000000e+00> : vector<16x16xf32>
    %27 = tpu.matmul %6, %26, %cst_24 {dimension_numbers = #tpu.dot_dimension_numbers<[1], [0], [0], [1], [0, 0, 1, 1], [], []>} : vector<16x128xbf16>, vector<128x16xbf16>, vector<16x16xf32> -> vector<16x16xf32>
    %cst_25 = arith.constant -1.000000e+00 : f32
    %28 = vector.broadcast %cst_25 : f32 to vector<16x16xf32>
    %29 = arith.addf %27, %28 : vector<16x16xf32>
    %c0_26 = arith.constant 0 : index
    %c1_27 = arith.constant 1 : index
    %c0_28 = arith.constant 0 : index
    %c0_29 = arith.constant 0 : index
    %30 = vector.load %arg5[%c0_26, %c1_27, %c0_28, %c0_29] : memref<1x3x16x16xf32, #tpu.memory_space<vmem>>, vector<1x1x16x16xf32>
    %31 = vector.shape_cast %30 : vector<1x1x16x16xf32> to vector<16x16xf32>
    %32 = vector.shape_cast %29 : vector<16x16xf32> to vector<1x1x16x16xf32>
    tpu.vector_store %arg5[%c0_26, %c1_27, %c0_28, %c0_29], %32 {strides = array<i32>} : memref<1x3x16x16xf32, #tpu.memory_space<vmem>>, vector<1x1x16x16xf32>,
    %c1_30 = arith.constant 1 : index
    %c0_31 = arith.constant 0 : index
    %c0_32 = arith.constant 0 : index
    %33 = vector.load %arg4[%c1_30, %c0_31, %c0_32] : memref<3x128x24xbf16, #tpu.memory_space<vmem>>, vector<1x128x24xbf16>
    %34 = vector.shape_cast %33 : vector<1x128x24xbf16> to vector<128x24xbf16>
    %cst_33 = arith.constant dense<0.000000e+00> : vector<24x24xf32>
    %35 = tpu.matmul %8, %34, %cst_33 {dimension_numbers = #tpu.dot_dimension_numbers<[1], [0], [0], [1], [0, 0, 1, 1], [], []>} : vector<24x128xbf16>, vector<128x24xbf16>, vector<24x24xf32> -> vector<24x24xf32>
    %cst_34 = arith.constant -1.75209713 : f32
    %36 = vector.broadcast %cst_34 : f32 to vector<24x24xf32>
    %37 = arith.addf %35, %36 : vector<24x24xf32>
    %c0_35 = arith.constant 0 : index
    %c1_36 = arith.constant 1 : index
    %c0_37 = arith.constant 0 : index
    %c0_38 = arith.constant 0 : index
    %38 = vector.load %arg6[%c0_35, %c1_36, %c0_37, %c0_38] : memref<1x3x24x24xf32, #tpu.memory_space<vmem>>, vector<1x1x24x24xf32>
    %39 = vector.shape_cast %38 : vector<1x1x24x24xf32> to vector<24x24xf32>
    %40 = vector.shape_cast %37 : vector<24x24xf32> to vector<1x1x24x24xf32>
    tpu.vector_store %arg6[%c0_35, %c1_36, %c0_37, %c0_38], %40 {strides = array<i32>} : memref<1x3x24x24xf32, #tpu.memory_space<vmem>>, vector<1x1x24x24xf32>,
    %c2 = arith.constant 2 : index
    %c0_39 = arith.constant 0 : index
    %c0_40 = arith.constant 0 : index
    %41 = vector.load %arg3[%c2, %c0_39, %c0_40] : memref<3x128x16xbf16, #tpu.memory_space<vmem>>, vector<1x128x16xbf16>
    %42 = vector.shape_cast %41 : vector<1x128x16xbf16> to vector<128x16xbf16>
    %cst_41 = arith.constant dense<0.000000e+00> : vector<16x16xf32>
    %43 = tpu.matmul %6, %42, %cst_41 {dimension_numbers = #tpu.dot_dimension_numbers<[1], [0], [0], [1], [0, 0, 1, 1], [], []>} : vector<16x128xbf16>, vector<128x16xbf16>, vector<16x16xf32> -> vector<16x16xf32>
    %cst_42 = arith.constant -1.000000e+00 : f32
    %44 = vector.broadcast %cst_42 : f32 to vector<16x16xf32>
    %45 = arith.addf %43, %44 : vector<16x16xf32>
    %c0_43 = arith.constant 0 : index
    %c2_44 = arith.constant 2 : index
    %c0_45 = arith.constant 0 : index
    %c0_46 = arith.constant 0 : index
    %46 = vector.load %arg5[%c0_43, %c2_44, %c0_45, %c0_46] : memref<1x3x16x16xf32, #tpu.memory_space<vmem>>, vector<1x1x16x16xf32>
    %47 = vector.shape_cast %46 : vector<1x1x16x16xf32> to vector<16x16xf32>
    %48 = vector.shape_cast %45 : vector<16x16xf32> to vector<1x1x16x16xf32>
    tpu.vector_store %arg5[%c0_43, %c2_44, %c0_45, %c0_46], %48 {strides = array<i32>} : memref<1x3x16x16xf32, #tpu.memory_space<vmem>>, vector<1x1x16x16xf32>,
    %c2_47 = arith.constant 2 : index
    %c0_48 = arith.constant 0 : index
    %c0_49 = arith.constant 0 : index
    %49 = vector.load %arg4[%c2_47, %c0_48, %c0_49] : memref<3x128x24xbf16, #tpu.memory_space<vmem>>, vector<1x128x24xbf16>
    %50 = vector.shape_cast %49 : vector<1x128x24xbf16> to vector<128x24xbf16>
    %cst_50 = arith.constant dense<0.000000e+00> : vector<24x24xf32>
    %51 = tpu.matmul %8, %50, %cst_50 {dimension_numbers = #tpu.dot_dimension_numbers<[1], [0], [0], [1], [0, 0, 1, 1], [], []>} : vector<24x128xbf16>, vector<128x24xbf16>, vector<24x24xf32> -> vector<24x24xf32>
    %cst_51 = arith.constant -1.48021984 : f32
    %52 = vector.broadcast %cst_51 : f32 to vector<24x24xf32>
    %53 = arith.addf %51, %52 : vector<24x24xf32>
    %c0_52 = arith.constant 0 : index
    %c2_53 = arith.constant 2 : index
    %c0_54 = arith.constant 0 : index
    %c0_55 = arith.constant 0 : index
    %54 = vector.load %arg6[%c0_52, %c2_53, %c0_54, %c0_55] : memref<1x3x24x24xf32, #tpu.memory_space<vmem>>, vector<1x1x24x24xf32>
    %55 = vector.shape_cast %54 : vector<1x1x24x24xf32> to vector<24x24xf32>
    %56 = vector.shape_cast %53 : vector<24x24xf32> to vector<1x1x24x24xf32>
    tpu.vector_store %arg6[%c0_52, %c2_53, %c0_54, %c0_55], %56 {strides = array<i32>} : memref<1x3x24x24xf32, #tpu.memory_space<vmem>>, vector<1x1x24x24xf32>,
    return
  }
  func.func @transform_0(%arg0: i32) -> (i32, i32, i32) {
    %c0_i32 = arith.constant 0 : i32
    %c0_i32_0 = arith.constant 0 : i32
    %c0_i32_1 = arith.constant 0 : i32
    return %arg0, %c0_i32, %c0_i32_0 : i32, i32, i32
  }
  func.func @transform_1(%arg0: i32) -> (i32, i32) {
    %c0_i32 = arith.constant 0 : i32
    %c0_i32_0 = arith.constant 0 : i32
    %c0_i32_1 = arith.constant 0 : i32
    return %c0_i32, %c0_i32_0 : i32, i32
  }
  func.func @transform_2(%arg0: i32) -> (i32, i32, i32) {
    %c0_i32 = arith.constant 0 : i32
    %c0_i32_0 = arith.constant 0 : i32
    %c0_i32_1 = arith.constant 0 : i32
    %c0_i32_2 = arith.constant 0 : i32
    return %c0_i32, %c0_i32_0, %c0_i32_1 : i32, i32, i32
  }
  func.func @transform_3(%arg0: i32) -> (i32, i32, i32) {
    %c0_i32 = arith.constant 0 : i32
    %c0_i32_0 = arith.constant 0 : i32
    %c0_i32_1 = arith.constant 0 : i32
    %c0_i32_2 = arith.constant 0 : i32
    return %c0_i32, %c0_i32_0, %c0_i32_1 : i32, i32, i32
  }
  func.func @transform_4(%arg0: i32) -> (i32, i32, i32, i32) {
    %c0_i32 = arith.constant 0 : i32
    %c0_i32_0 = arith.constant 0 : i32
    %c0_i32_1 = arith.constant 0 : i32
    %c0_i32_2 = arith.constant 0 : i32
    return %arg0, %c0_i32, %c0_i32_0, %c0_i32_1 : i32, i32, i32, i32
  }
  func.func @transform_5(%arg0: i32) -> (i32, i32, i32, i32) {
    %c0_i32 = arith.constant 0 : i32
    %c0_i32_0 = arith.constant 0 : i32
    %c0_i32_1 = arith.constant 0 : i32
    %c0_i32_2 = arith.constant 0 : i32
    return %arg0, %c0_i32, %c0_i32_0, %c0_i32_1 : i32, i32, i32, i32
  }
}

</mosaic_0001>

<bundles_post_ra>
// kernel: data_processor_forward.1
= control target key start
LH: loop header
LB: loop body
LE: loop exit
PB: predicated region body
PF: predicated region fallthrough
CT: control target
= control target key end

     0   :  { %11 = vsyncpa [#allocation3], 0  ;;  %s2095_s0 = inlined_call_operand.vmem [shape: u8[2,32,128], index: 0, kind: input, shape index: {}]   ;;  %s2096_s1 = inlined_call_operand.vmem [shape: bf16[40,32], index: 1, kind: input, shape index: {}]   ;;  %s2097_s2 = inlined_call_operand.vmem [shape: bf16[3,128,16], index: 2, kind: input, shape index: {}]   ;;  %s2098_s3 = inlined_call_operand.hbm [shape: bf16[3,128,24], index: 3, kind: input, shape index: {}]   ;;  %s2099_s4 = inlined_call_operand.hbm [shape: f32[2,3,16,16], index: 4, kind: output, shape index: {0}]   ;;  %s2100_s5 = inlined_call_operand.hbm [shape: f32[2,3,24,24], index: 5, kind: output, shape index: {1}]  }
   0x1   :  { %12 = vsyncpa [#allocation4], 0 }
   0x2   :  { %14 = vsyncpa [#allocation4 + $0x1], 0 }
   0x3   :  { %15 = vsyncpa [#allocation7], 0 }
   0x4   :  { %17 = vsyncpa [#allocation7 + $0x1], 0  ;;  %s1742_s18 = smov 0   ;;  %s1744_s19 = smov 0  }
   0x5   :  { %s1746_s20 = smov 0   ;;  %s1748_s21 = smov 0  }
   0x6 LB: > { %s1763_s22 = sadd.s32 4294967295, %s1701_s21   ;;  %s1154_s23 = sadd.s32 4294967294, %s1701_s21   ;;  %s1701_s21 = sphi %s1748_s21, %s2116_s21   ;;  %s1697_s20 = sphi %s1746_s20, %s2115_s20   ;;  %s1693_s19 = sphi %s1744_s19, %s2114_s19   ;;  %s1689_s18 = sphi %s1742_s18, %s2113_s18  }
   0x7   : > { %s1767_s24 = sadd.s32 1, %s1701_s21   ;;  %s119_s25 = sadd.s32 1, %s1697_s20 }
   0x8   : > { %s116_s26 = ssub.s32 %s1701_s21, %s1767_s24  ;;  %p129_p0 = scmp.ne.s32.totalorder %s1697_s20, %s1693_s19 }
   0x9   : > { %p117_p1 = scmp.eq.s32.totalorder %s116_s26, 0  ;;  %p130_p2 = scmp.eq.s32.totalorder %s1763_s22, 1 }
   0xa   : > { %p135_p3 = scmp.ne.s32.totalorder %s1693_s19, %s1689_s18  ;;  %p136_p4 = scmp.eq.s32.totalorder %s1154_s23, 1 }
   0xb   : > { %s1778_s27 = scalar_select %p117_p1, %s1697_s20, %s119_s25  }
   0xc   : > { %p1780_p5 = por %p130_p2, %p129_p0  ;;  %p1784_p6 = por %p136_p4, %p135_p3 }
   0xd   : > { %p1155_p7 = scmp.ge.s32.totalorder %s1701_s21, 1  ;;  %p169_p8 = scmp.lt.s32.totalorder %s1701_s21, 3 }
   0xe   : > { %s2104_s28 = scalar_select %p1780_p5, 1, 0 }
   0xf   : > { %s2105_s29 = scalar_select %p1784_p6, 1, 0 }
  0x10   : > { %p2101_p9 = scmp.eq.s32.totalorder %s1763_s22, 0  ;;  %p1791_p10 = pnand %p1155_p7, %p169_p8 }
  0x11   : > { %s1703_s6 = smov [#allocation2]   ;;  %s1575_s11 = scalar_lea.hbm %s2098_s3, 3072 }
  0x12   : > { %s2106_s30 = scalar_select %p1791_p10, 1, 0 }
  0x13   : > { %s187_s7 = sshll.u32 %s1703_s6, 4  ;;  %p1471_p11 = pneg %p1791_p10  ;;  %s188_s7 = int_to_ptr.vmem [resolvable:$true] %s187_s7 }
  0x14   : > { %p1576_p13 = scmp.ne.s32.totalorder %s2098_s3, %s1575_s11  ;;  %p1582_p3 = scmp.lt.u32.totalorder %s1575_s11, %s2098_s3 }
  0x15   : > { %p1799_p12 = pnand %p2101_p9, %p1471_p11 }
  0x17   : > { %p1577_p0 = pneg %p1799_p12 }
  0x19   : > { %p1578_p1 = pnand %p1577_p0, %p1576_p13 }
  0x1b   : > { %p1579_p2 = pneg %p1578_p1 }
  0x1d   : > { %p1584_p4 = pnand %p1582_p3, %p1579_p2 }
  0x1f   : > { %1587 = shalt.err (!%p1584_p4)
}
  0x20   : > { %s1588_s16 = scalar_lea.vmem %s188_s7, 3072  ;;  %p1596_p9 = scmp.lt.s32.totalorder %s188_s7, %s188_s7 }
  0x21   : > { %p1589_p7 = scmp.ne.s32.totalorder %s188_s7, %s1588_s16  ;;  %p1597_p6 = scmp.lt.s32.totalorder %s1588_s16, %s1588_s16 }
  0x23   : > { %p1591_p8 = pnand %p1589_p7, %p1577_p0  ;;  %p1598_p5 = por %p1597_p6, %p1596_p9 }
  0x25   : > { %p1592_p11 = pneg %p1591_p8 }
  0x27   : > { %p1599_p10 = pnand %p1598_p5, %p1592_p11 }
  0x29   : > { %1602 = shalt.err (!%p1599_p10)
}
  0x2a   : > { %s1704_s17 = smov 64   ;;  %s1705_s23 = smov 4  }
  0x2b   : > { %1474 = dma.hbm_to_vmem [thread:$0]  (!%p1799_p12), %s2098_s3, 3072, %s188_s7, [#allocation3], %s1704_s17, %s1704_s17, %s1705_s23  }
  0x2c   : > { %p2108_p13 = scmp.ne.s32.totalorder %s2106_s30, 0 }
  0x2d   : > { %p2109_p1 = scmp.eq.s32.totalorder (!%p2108_p13), %s1763_s22, 0 }
  0x2e   : > { %210 = sbr.rel (%p2108_p13) target bundleno = 606 (0x25e), region = 36 }
  0x35   : > { %1676 = dma.done.wait (%p2109_p1), [#allocation3], 3072   ;;  %p2110_p0 = pmov %p2109_p1 }
  0x36   : > { %p242_p5 = scmp.lt.s32.totalorder %s1763_s22, 1  ;;  %v1706_v0 = vmov 0.0   ;;  %vm1707_vm0 = vmmov 0   ;;  %v1527_v4 = vld [vmem:[%s2097_s2] sm:$0xff]   ;;  %v1528_v5 = vld [vmem:[%s2097_s2 + $0x8] sm:$0xff]   ;;  %vm268_vm1 = vcmask 261120  }
  0x37   : > { %1678 = vsyncadd (%p2110_p0), [#allocation3], 4294964224  ;;  %1323 = vmatprep.subr.bf16.mxu0 %v1706_v0  ;;  %1327 = vmatprep.mubr.msk.bf16.mxu0 %vm1707_vm0, %v1706_v0  ;;  %v1524_v6 = vld [vmem:[%s2096_s1] sm:$0xff]   ;;  %v1529_v8 = vld [vmem:[%s2097_s2 + $0x10] sm:$0xff]   ;;  %s1968_s16 = sand.u32 1, %s1693_s19   ;;  %vm442_vm2 = vcmask 130048  }
  0x38   : > { %s243_s6 = scalar_select %p242_p5, %s1763_s22, 1  ;;  %1339 = vmatprep.subr.bf16.mxu1 %v1706_v0  ;;  %1355 = vmatprep.mubr.msk.bf16.mxu1 %vm1707_vm0, %v1706_v0  ;;  %v1531_v7 = vld [vmem:[#allocation2] sm:$0xff]   ;;  %v1533_v9 = vld [vmem:[#allocation2 + $0x8] sm:$0xff]   ;;  %v1535_v11 = vld [vmem:[#allocation2 + $0x10] sm:$0xff]   ;;  %vm557_vm3 = vcmask 195584  }
  0x39   : > { %1340 = vmatpush3.bf16.msra.mxu1 %v1527_v4  ;;  %v1525_v10 = vld [vmem:[%s2096_s1 + $0x8] sm:$0xff]   ;;  %v1530_v12 = vld [vmem:[%s2097_s2 + $0x18] sm:$0xff]   ;;  %v1532_v14 = vld [vmem:[%s2097_s2 + $0x20] sm:$0xff]   ;;  %s1459_s17 = smul.u32 48, %s1968_s16  ;;  %s1014_s10 = scalar_lea.sflag [#allocation4], %s1968_s16 }
  0x3a   : > { %s1160_s30 = sshll.u32 %s243_s6, 3  ;;  %1341 = vmatprep.subr.bf16.mxu1 %v1706_v0  ;;  %v1537_v13 = vld [vmem:[#allocation2 + $0x18] sm:$0xff]   ;;  %v1534_v15 = vld [vmem:[%s2097_s2 + $0x28] sm:$0xff]   ;;  %v1526_v16 = vld [vmem:[%s2096_s1 + $0x10] ss:$0 sps:$4 sm:$0xff]   ;;  %s1460_s25 = smul.u32 72, %s1968_s16 }
  0x3b   : > { %s245_s9 = scalar_lea.vmem %s2095_s0, %s1160_s30  ;;  %v1536_v17 = vld [vmem:[%s2097_s2 + $0x30] sm:$0xff]   ;;  %v1538_v18 = vld [vmem:[%s2097_s2 + $0x38] sm:$0xff]   ;;  %v1539_v19 = vld [vmem:[#allocation2 + $0x20] sm:$0xff]   ;;  %s1971_s23 = scalar_lea.vmem [#allocation5], %s1459_s17 }
  0x3c   : > { %v247_v1 = vld [vmem:[%s245_s9] sm:$0xff]  ;;  %v1541_v20 = vld [vmem:[#allocation2 + $0x28] sm:$0xff]   ;;  %v1543_v21 = vld [vmem:[#allocation2 + $0x30] sm:$0xff]   ;;  %s1978_s26 = scalar_lea.vmem [#allocation6], %s1460_s25  ;;  %s1461_s6 = smul.u32 768, %s1763_s22 }
  0x3d   : > { %v248_v2 = vunpack.c.l.u8.bf16 %v247_v1  ;;  %v249_v3 = vunpack.c.h.u8.bf16 %v247_v1  ;;  %1342 = vmatpush3.bf16.msra.mxu1 %v1528_v5  ;;  %v1545_v22 = vld [vmem:[#allocation2 + $0x38] sm:$0xff]   ;;  %v1547_v23 = vld [vmem:[#allocation2 + $0x40] sm:$0xff]   ;;  %v1542_v30 = vld [vmem:[%s2097_s2 + $0x48] sm:$0xff]   ;;  %s1032_s30 = sshll.u32 %s1971_s23, 4  ;;  %p2111_p9 = scmp.ne.s32.totalorder %s2104_s28, 0  ;;  %s1998_s30 = int_to_ptr.vmem [resolvable:$true] %s1032_s30 }
  0x3e   : > { %1343 = vmatprep.subr.bf16.mxu1 %v1706_v0  ;;  %v1540_v27 = vld [vmem:[%s2097_s2 + $0x40] sm:$0xff]   ;;  %v1544_v34 = vld [vmem:[%s2097_s2 + $0x50] sm:$0xff]   ;;  %v1546_v37 = vld [vmem:[%s2097_s2 + $0x58] sm:$0xff]   ;;  %s2003_s9 = scalar_lea.hbm %s2099_s4, %s1461_s6  ;;  %s1603_s11 = scalar_lea.vmem %s1998_s30, 768 }
  0x3f   : > { %1324 = vmatpush3.bf16.msra.mxu0 %v248_v2  ;;  %v1549_v41 = vld [vmem:[#allocation2 + $0x48] sm:$0xff]   ;;  %v1548_v43 = vld [vmem:[%s2097_s2 + $0x60] sm:$0xff]   ;;  %v1551_v45 = vld [vmem:[#allocation2 + $0x50] sm:$0xff]   ;;  %p1604_p6 = scmp.ne.s32.totalorder %s1998_s30, %s1603_s11  ;;  %s1708_s12 = smov [#allocation5]  }
  0x40   : > { %1325 = vmatprep.subr.bf16.mxu0 %v1706_v0  ;;  %v1550_v46 = vld [vmem:[%s2097_s2 + $0x68] sm:$0xff]   ;;  %v1553_v47 = vld [vmem:[#allocation2 + $0x58] sm:$0xff]   ;;  %v1552_v48 = vld [vmem:[%s2097_s2 + $0x70] sm:$0xff]   ;;  %s1607_s13 = sshll.u32 %s1708_s12, 4  ;;  %s1608_s13 = int_to_ptr.vmem [resolvable:$false] %s1607_s13 }
  0x41   : > { %1344 = vmatpush3.bf16.msra.mxu1 %v1529_v8  ;;  %v1555_v49 = vld [vmem:[#allocation2 + $0x60] sm:$0xff]   ;;  %v1554_v50 = vld [vmem:[%s2097_s2 + $0x78] sm:$0xff]   ;;  %v1557_v51 = vld [vmem:[#allocation2 + $0x68] sm:$0xff]   ;;  %p1605_p10 = pnand %p1604_p6, %p2111_p9  ;;  %s1609_s14 = scalar_lea.vmem %s1608_s13, 1536 }
  0x42   : > { %1345 = vmatprep.subr.bf16.mxu1 %v1706_v0  ;;  %v1556_v52 = vld [vmem:[%s2097_s2 + $0x80] sm:$0xff]   ;;  %v1559_v53 = vld [vmem:[#allocation2 + $0x70] sm:$0xff]   ;;  %v1558_v54 = vld [vmem:[%s2097_s2 + $0x88] sm:$0xff]   ;;  %p1610_p2 = scmp.lt.s32.totalorder %s1998_s30, %s1608_s13  ;;  %p1611_p3 = scmp.lt.s32.totalorder %s1609_s14, %s1603_s11 }
  0x43   : > { %1326 = vmatpush3.bf16.msra.mxu0 %v249_v3  ;;  %v1561_v55 = vld [vmem:[#allocation2 + $0x78] sm:$0xff]   ;;  %v1560_v56 = vld [vmem:[%s2097_s2 + $0x90] sm:$0xff]   ;;  %v1563_v57 = vld [vmem:[#allocation2 + $0x80] sm:$0xff]   ;;  %p1606_p12 = pneg %p1605_p10 }
  0x44   : > { %1359 = vmatprep.subr.bf16.mxu0 %v1531_v7  ;;  %v1562_v58 = vld [vmem:[%s2097_s2 + $0x98] sm:$0xff]   ;;  %v1565_v59 = vld [vmem:[#allocation2 + $0x88] sm:$0xff]   ;;  %v1564_v60 = vld [vmem:[%s2097_s2 + $0xa0] sm:$0xff]   ;;  %p1612_p4 = por %p1611_p3, %p1610_p2 }
  0x45   : > { %1346 = vmatpush3.bf16.msra.mxu1 %v1530_v12  ;;  %v1567_v61 = vld [vmem:[#allocation2 + $0x90] sm:$0xff]   ;;  %v1566_v62 = vld [vmem:[%s2097_s2 + $0xa8] sm:$0xff]   ;;  %v1569_v63 = vld [vmem:[#allocation2 + $0x98] sm:$0xff]  }
  0x46   : > { %1328 = vmatmul.mubr.msk.bf16.vlgmr.msra.gmra.mrb[0].mxu0 %vm268_vm1, %v1524_v6  ;;  %1347 = vmatprep.subr.bf16.mxu1 %v1706_v0  ;;  %v1568_v1 = vld [vmem:[%s2097_s2 + $0xb0] sm:$0xff]   ;;  %v1571_v2 = vld [vmem:[#allocation2 + $0xa0] sm:$0xff]   ;;  %v1570_v3 = vld [vmem:[%s2097_s2 + $0xb8] sm:$0xff]   ;;  %p1613_p7 = pnand %p1612_p4, %p1606_p12 }
  0x47   : > { %1331 = vmatprep.mubr.msk.bf16.mxu0 %vm1707_vm0, %v1706_v0  ;;  %1360 = vmatpush3.bf16.msra.mxu0 %v1531_v7  ;;  %v1572_v4 = vld [vmem:[#allocation2 + $0xa8] sm:$0xff]   ;;  %v1573_v5 = vld [vmem:[#allocation2 + $0xb0] sm:$0xff]   ;;  %v1574_v6 = vld [vmem:[#allocation2 + $0xb8] sm:$0xff]  }
  0x48   : > { %1361 = vmatprep.subr.bf16.mxu0 %v1533_v9 }
  0x49   : > { %1348 = vmatpush3.bf16.msra.mxu1 %v1532_v14 }
  0x4a   : > { %1349 = vmatprep.subr.bf16.mxu1 %v1706_v0 }
  0x4b   : > { %1362 = vmatpush3.bf16.msra.mxu0 %v1533_v9 }
  0x4c   : > { %1363 = vmatprep.subr.bf16.mxu0 %v1535_v11 }
  0x4d   : > { %1350 = vmatpush3.bf16.msra.mxu1 %v1534_v15 }
  0x4e   : > { %1332 = vmatmul.mubr.msk.bf16.gmra.mrb[4].mxu0 %vm268_vm1, %v1525_v10  ;;  %1351 = vmatprep.subr.bf16.mxu1 %v1706_v0 }
  0x4f   : > { %1335 = vmatprep.mubr.msk.bf16.mxu0 %vm1707_vm0, %v1706_v0  ;;  %1364 = vmatpush3.bf16.msra.mxu0 %v1535_v11 }
  0x50   : > { %1365 = vmatprep.subr.bf16.mxu0 %v1537_v13 }
  0x51   : > { %1352 = vmatpush3.bf16.msra.mxu1 %v1536_v17 }
  0x52   : > { %1353 = vmatprep.subr.bf16.mxu1 %v1706_v0 }
  0x53   : > { %1366 = vmatpush3.bf16.msra.mxu0 %v1537_v13 }
  0x54   : > { %1367 = vmatprep.subr.bf16.mxu0 %v1539_v19 }
  0x55   : > { %1354 = vmatpush3.bf16.msra.mxu1 %v1538_v18 }
  0x56   : > { %1336 = vmatmul.mubr.msk.bf16.gmra.mrb[8].mxu0 %vm268_vm1, %v1526_v16  ;;  %1379 = vmatprep.subr.bf16.mxu1 %v1706_v0 }
  0x57   : > { %1368 = vmatpush3.bf16.msra.mxu0 %v1539_v19 }
  0x58   : > { %1369 = vmatprep.subr.bf16.mxu0 %v1541_v20 }
  0x5b   : > { %1370 = vmatpush3.bf16.msra.mxu0 %v1541_v20 }
  0x5c   : > { %1371 = vmatprep.subr.bf16.mxu0 %v1543_v21 }
  0x5f   : > { %1372 = vmatpush3.bf16.msra.mxu0 %v1543_v21 }
  0x60   : > { %1373 = vmatprep.subr.bf16.mxu0 %v1545_v22 }
  0x63   : > { %1374 = vmatpush3.bf16.msra.mxu0 %v1545_v22 }
  0x64   : > { %1399 = vmatprep.subr.bf16.mxu0 %v1547_v23 }
 0x119   : > { %v312_v24 = vpop.f32.mrb[0].mxu0 }
 0x11a   : > { %v1329_v25 = vpop.f32.mrb[1].mxu0 }
 0x11b   : > { %v315_v26 = vpop.f32.mrb[2].mxu0 }
 0x11c   : > { %v1888_v28 = vpack.c.bf16 %v315_v26, %v312_v24  ;;  %v1330_v29 = vpop.f32.mrb[3].mxu0 }
 0x11e   : > { %1356 = vmatmul.mubr.bf16.vlgmr.msra.gmra.mrb[0].mxu1 %v1888_v28 }
 0x11f   : > { %1380 = vmatpush3.bf16.msra.mxu1 %v1540_v27  ;;  %1395 = vmatprep.mubr.msk.bf16.mxu1 %vm1707_vm0, %v1706_v0 }
 0x120   : > { %1381 = vmatprep.subr.bf16.mxu1 %v1706_v0 }
 0x121   : > { %v320_v31 = vpop.f32.mrb[4].mxu0 }
 0x122   : > { %v1333_v32 = vpop.f32.mrb[5].mxu0 }
 0x123   : > { %1382 = vmatpush3.bf16.msra.mxu1 %v1542_v30  ;;  %v323_v33 = vpop.f32.mrb[6].mxu0 }
 0x124   : > { %v1900_v35 = vpack.c.bf16 %v323_v33, %v320_v31  ;;  %v1334_v36 = vpop.f32.mrb[7].mxu0  ;;  %1383 = vmatprep.subr.bf16.mxu1 %v1706_v0 }
 0x126   : > { %1375 = vmatprep.mubr.bf16.mxu0 %v1900_v35 }
 0x127   : > { %1384 = vmatpush3.bf16.msra.mxu1 %v1544_v34 }
 0x128   : > { %1385 = vmatprep.subr.bf16.mxu1 %v1706_v0 }
 0x129   : > { %v328_v38 = vpop.f32.mrb[8].mxu0 }
 0x12a   : > { %v1908_v39 = vpack.c.bf16 %v328_v38, %v328_v38  ;;  %v1337_v40 = vpop.f32.mrb[9].mxu0 }
 0x12b   : > { %1386 = vmatpush3.bf16.msra.mxu1 %v1546_v37  ;;  %v331_v42 = vpop.f32.mrb[10].mxu0 }
 0x12c   : > { %v1338_v44 = vpop.f32.mrb[11].mxu0  ;;  %1376 = vmatmul.mubr.bf16.vlgmr.msra.gmra.mrb[12].mxu0 %v1908_v39  ;;  %1387 = vmatprep.subr.bf16.mxu1 %v1706_v0 }
 0x12d   : > { %1400 = vmatpush3.bf16.msra.mxu0 %v1547_v23  ;;  %1415 = vmatprep.mubr.bf16.mxu0 %v1900_v35 }
 0x12e   : > { %1401 = vmatprep.subr.bf16.mxu0 %v1549_v41 }
 0x12f   : > { %1388 = vmatpush3.bf16.msra.mxu1 %v1548_v43 }
 0x130   : > { %1389 = vmatprep.subr.bf16.mxu1 %v1706_v0 }
 0x131   : > { %1402 = vmatpush3.bf16.msra.mxu0 %v1549_v41 }
 0x132   : > { %1403 = vmatprep.subr.bf16.mxu0 %v1551_v45 }
 0x133   : > { %1390 = vmatpush3.bf16.msra.mxu1 %v1550_v46 }
 0x134   : > { %1391 = vmatprep.subr.bf16.mxu1 %v1706_v0 }
 0x135   : > { %1404 = vmatpush3.bf16.msra.mxu0 %v1551_v45 }
 0x136   : > { %1405 = vmatprep.subr.bf16.mxu0 %v1553_v47 }
 0x137   : > { %1392 = vmatpush3.bf16.msra.mxu1 %v1552_v48 }
 0x138   : > { %1393 = vmatprep.subr.bf16.mxu1 %v1706_v0 }
 0x139   : > { %1406 = vmatpush3.bf16.msra.mxu0 %v1553_v47 }
 0x13a   : > { %1407 = vmatprep.subr.bf16.mxu0 %v1555_v49 }
 0x13b   : > { %1394 = vmatpush3.bf16.msra.mxu1 %v1554_v50 }
 0x13c   : > { %1419 = vmatprep.subr.bf16.mxu1 %v1706_v0 }
 0x13d   : > { %1408 = vmatpush3.bf16.msra.mxu0 %v1555_v49 }
 0x13e   : > { %1396 = vmatmul.mubr.bf16.vlgmr.msra.gmra.mrb[4].mxu1 %v1888_v28  ;;  %1409 = vmatprep.subr.bf16.mxu0 %v1557_v51 }
 0x13f   : > { %1420 = vmatpush3.bf16.msra.mxu1 %v1556_v52  ;;  %1435 = vmatprep.mubr.msk.bf16.mxu1 %vm1707_vm0, %v1706_v0 }
 0x140   : > { %1421 = vmatprep.subr.bf16.mxu1 %v1706_v0 }
 0x141   : > { %1410 = vmatpush3.bf16.msra.mxu0 %v1557_v51 }
 0x142   : > { %1411 = vmatprep.subr.bf16.mxu0 %v1559_v53 }
 0x143   : > { %1422 = vmatpush3.bf16.msra.mxu1 %v1558_v54 }
 0x144   : > { %1423 = vmatprep.subr.bf16.mxu1 %v1706_v0 }
 0x145   : > { %1412 = vmatpush3.bf16.msra.mxu0 %v1559_v53 }
 0x146   : > { %1413 = vmatprep.subr.bf16.mxu0 %v1561_v55 }
 0x147   : > { %1424 = vmatpush3.bf16.msra.mxu1 %v1560_v56 }
 0x148   : > { %1425 = vmatprep.subr.bf16.mxu1 %v1706_v0 }
 0x149   : > { %1414 = vmatpush3.bf16.msra.mxu0 %v1561_v55 }
 0x14a   : > { %1439 = vmatprep.subr.bf16.mxu0 %v1563_v57 }
 0x14b   : > { %1426 = vmatpush3.bf16.msra.mxu1 %v1562_v58 }
 0x14c   : > { %1416 = vmatmul.mubr.bf16.vlgmr.msra.gmra.mrb[16].mxu0 %v1908_v39  ;;  %1427 = vmatprep.subr.bf16.mxu1 %v1706_v0 }
 0x14d   : > { %1440 = vmatpush3.bf16.msra.mxu0 %v1563_v57  ;;  %1455 = vmatprep.mubr.bf16.mxu0 %v1900_v35 }
 0x14e   : > { %1441 = vmatprep.subr.bf16.mxu0 %v1565_v59 }
 0x14f   : > { %1428 = vmatpush3.bf16.msra.mxu1 %v1564_v60 }
 0x150   : > { %1429 = vmatprep.subr.bf16.mxu1 %v1706_v0 }
 0x151   : > { %1442 = vmatpush3.bf16.msra.mxu0 %v1565_v59 }
 0x152   : > { %1443 = vmatprep.subr.bf16.mxu0 %v1567_v61 }
 0x153   : > { %1430 = vmatpush3.bf16.msra.mxu1 %v1566_v62 }
 0x154   : > { %1431 = vmatprep.subr.bf16.mxu1 %v1706_v0 }
 0x155   : > { %1444 = vmatpush3.bf16.msra.mxu0 %v1567_v61 }
 0x156   : > { %1445 = vmatprep.subr.bf16.mxu0 %v1569_v63 }
 0x157   : > { %1432 = vmatpush3.bf16.msra.mxu1 %v1568_v1 }
 0x158   : > { %1433 = vmatprep.subr.bf16.mxu1 %v1706_v0 }
 0x159   : > { %1446 = vmatpush3.bf16.msra.mxu0 %v1569_v63 }
 0x15a   : > { %1447 = vmatprep.subr.bf16.mxu0 %v1571_v2 }
 0x15b   : > { %1434 = vmatpush3.bf16.msra.mxu1 %v1570_v3 }
 0x15d   : > { %1448 = vmatpush3.bf16.msra.mxu0 %v1571_v2 }
 0x15e   : > { %1436 = vmatmul.mubr.bf16.vlgmr.msra.gmra.mrb[8].mxu1 %v1888_v28  ;;  %1449 = vmatprep.subr.bf16.mxu0 %v1572_v4 }
 0x161   : > { %1450 = vmatpush3.bf16.msra.mxu0 %v1572_v4 }
 0x162   : > { %1451 = vmatprep.subr.bf16.mxu0 %v1573_v5 }
 0x165   : > { %1452 = vmatpush3.bf16.msra.mxu0 %v1573_v5 }
 0x166   : > { %1453 = vmatprep.subr.bf16.mxu0 %v1574_v6 }
 0x169   : > { %1454 = vmatpush3.bf16.msra.mxu0 %v1574_v6 }
 0x16c   : > { %1456 = vmatmul.mubr.bf16.vlgmr.msra.gmra.mrb[20].mxu0 %v1908_v39 }
 0x1f1   : > { %v435_v0 = vpop.f32.mrb[0].mxu1 }
 0x1f2   : > { %v436_v7 = vadd.f32 -1.0, %v435_v0  ;;  %v1357_v8 = vpop.f32.mrb[1].mxu1 }
 0x1f3   : > { %v438_v9 = vpop.f32.mrb[2].mxu1 }
 0x1f4   : > { %443 = vst.msk [vmem:[%s1971_s23] sm:$0xff] %vm442_vm2, %v436_v7  ;;  %v439_v10 = vadd.f32 -1.0, %v438_v9  ;;  %v1358_v11 = vpop.f32.mrb[3].mxu1 }
 0x1f6   : > { %444 = vst.msk [vmem:[%s1971_s23 + $0x8] sm:$0xff] %vm442_vm2, %v439_v10 }
 0x1ff   : > { %v1377_v12 = vpop.f32.mrb[12].mxu0 }
 0x200   : > { %v552_v13 = vadd.f32 -1.7922626, %v1377_v12  ;;  %v543_v14 = vpop.f32.mrb[13].mxu0 }
 0x201   : > { %v544_v15 = vadd.f32 -1.7922626, %v543_v14  ;;  %v1378_v16 = vpop.f32.mrb[14].mxu0 }
 0x202   : > { %560 = vst.msk [vmem:[%s1978_s26 + $0x10] sm:$0xff] %vm557_vm3, %v552_v13  ;;  %v546_v17 = vpop.f32.mrb[15].mxu0 }
 0x203   : > { %558 = vst.msk [vmem:[%s1978_s26] sm:$0xff] %vm557_vm3, %v544_v15  ;;  %v547_v18 = vadd.f32 -1.7922626, %v546_v17 }
 0x205   : > { %559 = vst.msk [vmem:[%s1978_s26 + $0x8] sm:$0xff] %vm557_vm3, %v547_v18 }
 0x211   : > { %v660_v19 = vpop.f32.mrb[4].mxu1 }
 0x212   : > { %v661_v20 = vadd.f32 -1.0, %v660_v19  ;;  %v1397_v21 = vpop.f32.mrb[5].mxu1 }
 0x213   : > { %v663_v22 = vpop.f32.mrb[6].mxu1 }
 0x214   : > { %1207 = vst.msk [vmem:[%s1971_s23 + $0x10] sm:$0xff] %vm442_vm2, %v661_v20  ;;  %v664_v23 = vadd.f32 -1.0, %v663_v22  ;;  %v1398_v24 = vpop.f32.mrb[7].mxu1 }
 0x216   : > { %1208 = vst.msk [vmem:[%s1971_s23 + $0x18] sm:$0xff] %vm442_vm2, %v664_v23 }
 0x21f   : > { %v1417_v25 = vpop.f32.mrb[16].mxu0 }
 0x220   : > { %v778_v26 = vadd.f32 -1.7520971, %v1417_v25  ;;  %v769_v27 = vpop.f32.mrb[17].mxu0 }
 0x221   : > { %v770_v28 = vadd.f32 -1.7520971, %v769_v27  ;;  %v1418_v29 = vpop.f32.mrb[18].mxu0 }
 0x222   : > { %1219 = vst.msk [vmem:[%s1978_s26 + $0x28] sm:$0xff] %vm557_vm3, %v778_v26  ;;  %v772_v30 = vpop.f32.mrb[19].mxu0 }
 0x223   : > { %1217 = vst.msk [vmem:[%s1978_s26 + $0x18] sm:$0xff] %vm557_vm3, %v770_v28  ;;  %v773_v31 = vadd.f32 -1.7520971, %v772_v30 }
 0x225   : > { %1218 = vst.msk [vmem:[%s1978_s26 + $0x20] sm:$0xff] %vm557_vm3, %v773_v31 }
 0x231   : > { %v886_v32 = vpop.f32.mrb[8].mxu1 }
 0x232   : > { %v887_v33 = vadd.f32 -1.0, %v886_v32  ;;  %v1437_v34 = vpop.f32.mrb[9].mxu1 }
 0x233   : > { %v889_v35 = vpop.f32.mrb[10].mxu1 }
 0x234   : > { %1244 = vst.msk [vmem:[%s1971_s23 + $0x20] sm:$0xff] %vm442_vm2, %v887_v33  ;;  %v890_v36 = vadd.f32 -1.0, %v889_v35  ;;  %v1438_v37 = vpop.f32.mrb[11].mxu1 }
 0x236   : > { %1245 = vst.msk [vmem:[%s1971_s23 + $0x28] sm:$0xff] %vm442_vm2, %v890_v36 }
 0x237   : > { %1616 = shalt.err (!%p1613_p7)
}
 0x238   : > { %s1617_s15 = scalar_lea.hbm %s2003_s9, 768  ;;  %s1621_s25 = scalar_lea.hbm %s2099_s4, 1536 }
 0x239   : > { %p1618_p8 = scmp.ne.s32.totalorder %s2003_s9, %s1617_s15  ;;  %p1622_p1 = scmp.lt.u32.totalorder %s2003_s9, %s2099_s4 }
 0x23a   : > { %p1623_p0 = scmp.lt.u32.totalorder %s1621_s25, %s1617_s15  ;;  %p1625_p6 = scmp.lt.u32.totalorder %s1617_s15, %s2003_s9 }
 0x23b   : > { %p1619_p11 = pnand %p1618_p8, %p2111_p9 }
 0x23c   : > { %p1624_p5 = por %p1623_p0, %p1622_p1 }
 0x23d   : > { %p1620_p13 = pneg %p1619_p11 }
 0x23e   : > { %p1626_p10 = por %p1625_p6, %p1624_p5 }
 0x240   : > { %p1627_p12 = pnand %p1626_p10, %p1620_p13 }
 0x242   : > { %1630 = shalt.err (!%p1627_p12)
}
 0x243   : > { %s1709_s8 = smov 128   ;;  %s1710_s11 = smov 8   ;;  %v1457_v38 = vpop.f32.mrb[20].mxu0 }
 0x244   : > { %1467 = dma.vmem_to_hbm [thread:$0]  (%p2111_p9), %s1998_s30, 768, %s2003_s9, %s1014_s10, %s1709_s8, %s1709_s8, %s1710_s11   ;;  %v1004_v39 = vadd.f32 -1.4802198, %v1457_v38  ;;  %v995_v40 = vpop.f32.mrb[21].mxu0 }
 0x245   : > { %s1462_s12 = smul.u32 1152, %s1763_s22  ;;  %s1048_s13 = sshll.u32 %s1978_s26, 4  ;;  %v996_v41 = vadd.f32 -1.4802198, %v995_v40  ;;  %v1458_v42 = vpop.f32.mrb[22].mxu0  ;;  %s2040_s13 = int_to_ptr.vmem [resolvable:$true] %s1048_s13 }
 0x246   : > { %1256 = vst.msk [vmem:[%s1978_s26 + $0x40] sm:$0xff] %vm557_vm3, %v1004_v39  ;;  %v998_v43 = vpop.f32.mrb[23].mxu0  ;;  %s1019_s10 = scalar_lea.sflag [#allocation7], %s1968_s16  ;;  %s1631_s14 = scalar_lea.vmem %s2040_s13, 1152 }
 0x247   : > { %1254 = vst.msk [vmem:[%s1978_s26 + $0x30] sm:$0xff] %vm557_vm3, %v996_v41  ;;  %v999_v44 = vadd.f32 -1.4802198, %v998_v43  ;;  %s2047_s22 = scalar_lea.hbm %s2100_s5, %s1462_s12  ;;  %p1632_p2 = scmp.ne.s32.totalorder %s2040_s13, %s1631_s14 }
 0x248   : > { %s1711_s15 = smov [#allocation6]  }
 0x249   : > { %1255 = vst.msk [vmem:[%s1978_s26 + $0x38] sm:$0xff] %vm557_vm3, %v999_v44  ;;  %p1633_p3 = pnand %p1632_p2, %p2111_p9  ;;  %s1635_s17 = sshll.u32 %s1711_s15, 4  ;;  %s1636_s17 = int_to_ptr.vmem [resolvable:$false] %s1635_s17 }
 0x24a   : > { %s1637_s23 = scalar_lea.vmem %s1636_s17, 2304  ;;  %p1638_p7 = scmp.lt.s32.totalorder %s2040_s13, %s1636_s17 }
 0x24b   : > { %p1634_p4 = pneg %p1633_p3  ;;  %p1639_p8 = scmp.lt.s32.totalorder %s1637_s23, %s1631_s14 }
 0x24d   : > { %p1640_p11 = por %p1639_p8, %p1638_p7 }
 0x24f   : > { %p1641_p13 = pnand %p1640_p11, %p1634_p4 }
 0x251   : > { %1644 = shalt.err (!%p1641_p13)
}
 0x252   : > { %s1645_s26 = scalar_lea.hbm %s2047_s22, 1152  ;;  %s1649_s7 = scalar_lea.hbm %s2100_s5, 2304 }
 0x253   : > { %p1646_p1 = scmp.ne.s32.totalorder %s2047_s22, %s1645_s26  ;;  %p1650_p6 = scmp.lt.u32.totalorder %s2047_s22, %s2100_s5 }
 0x254   : > { %p1651_p10 = scmp.lt.u32.totalorder %s1649_s7, %s1645_s26  ;;  %p1653_p2 = scmp.lt.u32.totalorder %s1645_s26, %s2047_s22 }
 0x255   : > { %p1647_p0 = pnand %p1646_p1, %p2111_p9 }
 0x256   : > { %p1652_p12 = por %p1651_p10, %p1650_p6 }
 0x257   : > { %p1648_p5 = pneg %p1647_p0 }
 0x258   : > { %p1654_p3 = por %p1653_p2, %p1652_p12 }
 0x25a   : > { %p1655_p4 = pnand %p1654_p3, %p1648_p5 }
 0x25c   : > { %1658 = shalt.err (!%p1655_p4)
}
 0x25d   : > { %1468 = dma.vmem_to_hbm [thread:$0]  (%p2111_p9), %s2040_s13, 1152, %s2047_s22, %s1019_s10, %s1709_s8, %s1709_s8, %s1710_s11  }
 0x25e PF: > { %p1484_p7 = scmp.ge.s32.totalorder %s1701_s21, 2  ;;  %s1063_s9 = sand.u32 1, %s1689_s18  }
 0x25f   : > { %p2112_p8 = scmp.ne.s32.totalorder %s2105_s29, 0  ;;  %s1064_s14 = scalar_lea.sflag [#allocation4], %s1063_s9 }
 0x261   : > { %p1476_p11 = pnand %p1484_p7, %p2112_p8 }
 0x263   : > { %1680 = dma.done.wait (!%p1476_p11), %s1064_s14, 768  }
 0x264   : > { %1682 = vsyncadd (!%p1476_p11), %s1064_s14, 4294966528  ;;  %s1073_s28 = scalar_lea.sflag [#allocation7], %s1063_s9 }
 0x265   : > { %1684 = dma.done.wait (!%p1476_p11), %s1073_s28, 1152  }
 0x266   : > { %1686 = vsyncadd (!%p1476_p11), %s1073_s28, 4294966144  ;;  %p20_p9 = scmp.ge.s32.totalorder %s1767_s24, 4   ;;  %s2113_s18 = smov %s1693_s19 }
 0x267   : > { %s2114_s19 = smov %s1697_s20  ;;  %s2115_s20 = smov %s1778_s27 }
 0x268   : > { %s2116_s21 = smov %s1767_s24  ;;  %22 = sbr.rel (!%p20_p9) target bundleno = 6 (0x6), region = 101 }
 0x26f   :  { %1078 = vsyncpa [#allocation3], 1 }
 0x270   :  { %1080 = vsyncpa [#allocation3 + $0x1], 1 }
 0x271   :  { %1081 = vsyncpa [#allocation4], 1 }
 0x272   :  { %1083 = vsyncpa [#allocation4 + $0x1], 1 }
 0x273   :  { %1084 = vsyncpa [#allocation7], 1 }
 0x274   :  { %1086 = vsyncpa [#allocation7 + $0x1], 1 }

// kernel: data_processor_forward.1
= control target key start
LH: loop header
LB: loop body
LE: loop exit
PB: predicated region body
PF: predicated region fallthrough
CT: control target
= control target key end

     0   :  { %11 = vsyncpa [#allocation3], 0  ;;  %s2095_s0 = inlined_call_operand.vmem [shape: u8[2,32,128], index: 0, kind: input, shape index: {}]   ;;  %s2096_s1 = inlined_call_operand.vmem [shape: bf16[40,32], index: 1, kind: input, shape index: {}]   ;;  %s2097_s2 = inlined_call_operand.vmem [shape: bf16[3,128,16], index: 2, kind: input, shape index: {}]   ;;  %s2098_s3 = inlined_call_operand.hbm [shape: bf16[3,128,24], index: 3, kind: input, shape index: {}]   ;;  %s2099_s4 = inlined_call_operand.hbm [shape: f32[2,3,16,16], index: 4, kind: output, shape index: {0}]   ;;  %s2100_s5 = inlined_call_operand.hbm [shape: f32[2,3,24,24], index: 5, kind: output, shape index: {1}]  }
   0x1   :  { %12 = vsyncpa [#allocation4], 0 }
   0x2   :  { %14 = vsyncpa [#allocation4 + $0x1], 0 }
   0x3   :  { %15 = vsyncpa [#allocation7], 0 }
   0x4   :  { %17 = vsyncpa [#allocation7 + $0x1], 0  ;;  %s1742_s18 = smov 0   ;;  %s1744_s19 = smov 0  }
   0x5   :  { %s1746_s20 = smov 0   ;;  %s1748_s21 = smov 0  }
   0x6 LB: > { %s1763_s22 = sadd.s32 4294967295, %s1701_s21   ;;  %s1154_s23 = sadd.s32 4294967294, %s1701_s21   ;;  %s1701_s21 = sphi %s1748_s21, %s2116_s21   ;;  %s1697_s20 = sphi %s1746_s20, %s2115_s20   ;;  %s1693_s19 = sphi %s1744_s19, %s2114_s19   ;;  %s1689_s18 = sphi %s1742_s18, %s2113_s18  }
   0x7   : > { %s1767_s24 = sadd.s32 1, %s1701_s21   ;;  %s119_s25 = sadd.s32 1, %s1697_s20 }
   0x8   : > { %s116_s26 = ssub.s32 %s1701_s21, %s1767_s24  ;;  %p129_p0 = scmp.ne.s32.totalorder %s1697_s20, %s1693_s19 }
   0x9   : > { %p117_p1 = scmp.eq.s32.totalorder %s116_s26, 0  ;;  %p130_p2 = scmp.eq.s32.totalorder %s1763_s22, 1 }
   0xa   : > { %p135_p3 = scmp.ne.s32.totalorder %s1693_s19, %s1689_s18  ;;  %p136_p4 = scmp.eq.s32.totalorder %s1154_s23, 1 }
   0xb   : > { %s1778_s27 = scalar_select %p117_p1, %s1697_s20, %s119_s25  }
   0xc   : > { %p1780_p5 = por %p130_p2, %p129_p0  ;;  %p1784_p6 = por %p136_p4, %p135_p3 }
   0xd   : > { %p1155_p7 = scmp.ge.s32.totalorder %s1701_s21, 1  ;;  %p169_p8 = scmp.lt.s32.totalorder %s1701_s21, 3 }
   0xe   : > { %s2104_s28 = scalar_select %p1780_p5, 1, 0 }
   0xf   : > { %s2105_s29 = scalar_select %p1784_p6, 1, 0 }
  0x10   : > { %p2101_p9 = scmp.eq.s32.totalorder %s1763_s22, 0  ;;  %p1791_p10 = pnand %p1155_p7, %p169_p8 }
  0x11   : > { %s1703_s6 = smov [#allocation2]   ;;  %s1575_s11 = scalar_lea.hbm %s2098_s3, 3072 }
  0x12   : > { %s2106_s30 = scalar_select %p1791_p10, 1, 0 }
  0x13   : > { %s187_s7 = sshll.u32 %s1703_s6, 4  ;;  %p1471_p11 = pneg %p1791_p10  ;;  %s188_s7 = int_to_ptr.vmem [resolvable:$true] %s187_s7 }
  0x14   : > { %p1576_p13 = scmp.ne.s32.totalorder %s2098_s3, %s1575_s11  ;;  %p1582_p3 = scmp.lt.u32.totalorder %s1575_s11, %s2098_s3 }
  0x15   : > { %p1799_p12 = pnand %p2101_p9, %p1471_p11 }
  0x17   : > { %p1577_p0 = pneg %p1799_p12 }
  0x19   : > { %p1578_p1 = pnand %p1577_p0, %p1576_p13 }
  0x1b   : > { %p1579_p2 = pneg %p1578_p1 }
  0x1d   : > { %p1584_p4 = pnand %p1582_p3, %p1579_p2 }
  0x1f   : > { %1587 = shalt.err (!%p1584_p4)
}
  0x20   : > { %s1588_s16 = scalar_lea.vmem %s188_s7, 3072  ;;  %p1596_p9 = scmp.lt.s32.totalorder %s188_s7, %s188_s7 }
  0x21   : > { %p1589_p7 = scmp.ne.s32.totalorder %s188_s7, %s1588_s16  ;;  %p1597_p6 = scmp.lt.s32.totalorder %s1588_s16, %s1588_s16 }
  0x23   : > { %p1591_p8 = pnand %p1589_p7, %p1577_p0  ;;  %p1598_p5 = por %p1597_p6, %p1596_p9 }
  0x25   : > { %p1592_p11 = pneg %p1591_p8 }
  0x27   : > { %p1599_p10 = pnand %p1598_p5, %p1592_p11 }
  0x29   : > { %1602 = shalt.err (!%p1599_p10)
}
  0x2a   : > { %s1704_s17 = smov 64   ;;  %s1705_s23 = smov 4  }
  0x2b   : > { %1474 = dma.hbm_to_vmem [thread:$0]  (!%p1799_p12), %s2098_s3, 3072, %s188_s7, [#allocation3], %s1704_s17, %s1704_s17, %s1705_s23  }
  0x2c   : > { %p2108_p13 = scmp.ne.s32.totalorder %s2106_s30, 0 }
  0x2d   : > { %p2109_p1 = scmp.eq.s32.totalorder (!%p2108_p13), %s1763_s22, 0 }
  0x2e   : > { %210 = sbr.rel (%p2108_p13) target bundleno = 606 (0x25e), region = 36 }
  0x35   : > { %1676 = dma.done.wait (%p2109_p1), [#allocation3], 3072   ;;  %p2110_p0 = pmov %p2109_p1 }
  0x36   : > { %p242_p5 = scmp.lt.s32.totalorder %s1763_s22, 1  ;;  %v1706_v0 = vmov 0.0   ;;  %vm1707_vm0 = vmmov 0   ;;  %v1527_v4 = vld [vmem:[%s2097_s2] sm:$0xff]   ;;  %v1528_v5 = vld [vmem:[%s2097_s2 + $0x8] sm:$0xff]   ;;  %vm268_vm1 = vcmask 261120  }
  0x37   : > { %1678 = vsyncadd (%p2110_p0), [#allocation3], 4294964224  ;;  %1323 = vmatprep.subr.bf16.mxu0 %v1706_v0  ;;  %1327 = vmatprep.mubr.msk.bf16.mxu0 %vm1707_vm0, %v1706_v0  ;;  %v1524_v6 = vld [vmem:[%s2096_s1] sm:$0xff]   ;;  %v1529_v8 = vld [vmem:[%s2097_s2 + $0x10] sm:$0xff]   ;;  %s1968_s16 = sand.u32 1, %s1693_s19   ;;  %vm442_vm2 = vcmask 130048  }
  0x38   : > { %s243_s6 = scalar_select %p242_p5, %s1763_s22, 1  ;;  %1339 = vmatprep.subr.bf16.mxu1 %v1706_v0  ;;  %1355 = vmatprep.mubr.msk.bf16.mxu1 %vm1707_vm0, %v1706_v0  ;;  %v1531_v7 = vld [vmem:[#allocation2] sm:$0xff]   ;;  %v1533_v9 = vld [vmem:[#allocation2 + $0x8] sm:$0xff]   ;;  %v1535_v11 = vld [vmem:[#allocation2 + $0x10] sm:$0xff]   ;;  %vm557_vm3 = vcmask 195584  }
  0x39   : > { %1340 = vmatpush3.bf16.msra.mxu1 %v1527_v4  ;;  %v1525_v10 = vld [vmem:[%s2096_s1 + $0x8] sm:$0xff]   ;;  %v1530_v12 = vld [vmem:[%s2097_s2 + $0x18] sm:$0xff]   ;;  %v1532_v14 = vld [vmem:[%s2097_s2 + $0x20] sm:$0xff]   ;;  %s1459_s17 = smul.u32 48, %s1968_s16  ;;  %s1014_s10 = scalar_lea.sflag [#allocation4], %s1968_s16 }
  0x3a   : > { %s1160_s30 = sshll.u32 %s243_s6, 3  ;;  %1341 = vmatprep.subr.bf16.mxu1 %v1706_v0  ;;  %v1537_v13 = vld [vmem:[#allocation2 + $0x18] sm:$0xff]   ;;  %v1534_v15 = vld [vmem:[%s2097_s2 + $0x28] sm:$0xff]   ;;  %v1526_v16 = vld [vmem:[%s2096_s1 + $0x10] ss:$0 sps:$4 sm:$0xff]   ;;  %s1460_s25 = smul.u32 72, %s1968_s16 }
  0x3b   : > { %s245_s9 = scalar_lea.vmem %s2095_s0, %s1160_s30  ;;  %v1536_v17 = vld [vmem:[%s2097_s2 + $0x30] sm:$0xff]   ;;  %v1538_v18 = vld [vmem:[%s2097_s2 + $0x38] sm:$0xff]   ;;  %v1539_v19 = vld [vmem:[#allocation2 + $0x20] sm:$0xff]   ;;  %s1971_s23 = scalar_lea.vmem [#allocation5], %s1459_s17 }
  0x3c   : > { %v247_v1 = vld [vmem:[%s245_s9] sm:$0xff]  ;;  %v1541_v20 = vld [vmem:[#allocation2 + $0x28] sm:$0xff]   ;;  %v1543_v21 = vld [vmem:[#allocation2 + $0x30] sm:$0xff]   ;;  %s1978_s26 = scalar_lea.vmem [#allocation6], %s1460_s25  ;;  %s1461_s6 = smul.u32 768, %s1763_s22 }
  0x3d   : > { %v248_v2 = vunpack.c.l.u8.bf16 %v247_v1  ;;  %v249_v3 = vunpack.c.h.u8.bf16 %v247_v1  ;;  %1342 = vmatpush3.bf16.msra.mxu1 %v1528_v5  ;;  %v1545_v22 = vld [vmem:[#allocation2 + $0x38] sm:$0xff]   ;;  %v1547_v23 = vld [vmem:[#allocation2 + $0x40] sm:$0xff]   ;;  %v1542_v30 = vld [vmem:[%s2097_s2 + $0x48] sm:$0xff]   ;;  %s1032_s30 = sshll.u32 %s1971_s23, 4  ;;  %p2111_p9 = scmp.ne.s32.totalorder %s2104_s28, 0  ;;  %s1998_s30 = int_to_ptr.vmem [resolvable:$true] %s1032_s30 }
  0x3e   : > { %1343 = vmatprep.subr.bf16.mxu1 %v1706_v0  ;;  %v1540_v27 = vld [vmem:[%s2097_s2 + $0x40] sm:$0xff]   ;;  %v1544_v34 = vld [vmem:[%s2097_s2 + $0x50] sm:$0xff]   ;;  %v1546_v37 = vld [vmem:[%s2097_s2 + $0x58] sm:$0xff]   ;;  %s2003_s9 = scalar_lea.hbm %s2099_s4, %s1461_s6  ;;  %s1603_s11 = scalar_lea.vmem %s1998_s30, 768 }
  0x3f   : > { %1324 = vmatpush3.bf16.msra.mxu0 %v248_v2  ;;  %v1549_v41 = vld [vmem:[#allocation2 + $0x48] sm:$0xff]   ;;  %v1548_v43 = vld [vmem:[%s2097_s2 + $0x60] sm:$0xff]   ;;  %v1551_v45 = vld [vmem:[#allocation2 + $0x50] sm:$0xff]   ;;  %p1604_p6 = scmp.ne.s32.totalorder %s1998_s30, %s1603_s11  ;;  %s1708_s12 = smov [#allocation5]  }
  0x40   : > { %1325 = vmatprep.subr.bf16.mxu0 %v1706_v0  ;;  %v1550_v46 = vld [vmem:[%s2097_s2 + $0x68] sm:$0xff]   ;;  %v1553_v47 = vld [vmem:[#allocation2 + $0x58] sm:$0xff]   ;;  %v1552_v48 = vld [vmem:[%s2097_s2 + $0x70] sm:$0xff]   ;;  %s1607_s13 = sshll.u32 %s1708_s12, 4  ;;  %s1608_s13 = int_to_ptr.vmem [resolvable:$false] %s1607_s13 }
  0x41   : > { %1344 = vmatpush3.bf16.msra.mxu1 %v1529_v8  ;;  %v1555_v49 = vld [vmem:[#allocation2 + $0x60] sm:$0xff]   ;;  %v1554_v50 = vld [vmem:[%s2097_s2 + $0x78] sm:$0xff]   ;;  %v1557_v51 = vld [vmem:[#allocation2 + $0x68] sm:$0xff]   ;;  %p1605_p10 = pnand %p1604_p6, %p2111_p9  ;;  %s1609_s14 = scalar_lea.vmem %s1608_s13, 1536 }
  0x42   : > { %1345 = vmatprep.subr.bf16.mxu1 %v1706_v0  ;;  %v1556_v52 = vld [vmem:[%s2097_s2 + $0x80] sm:$0xff]   ;;  %v1559_v53 = vld [vmem:[#allocation2 + $0x70] sm:$0xff]   ;;  %v1558_v54 = vld [vmem:[%s2097_s2 + $0x88] sm:$0xff]   ;;  %p1610_p2 = scmp.lt.s32.totalorder %s1998_s30, %s1608_s13  ;;  %p1611_p3 = scmp.lt.s32.totalorder %s1609_s14, %s1603_s11 }
  0x43   : > { %1326 = vmatpush3.bf16.msra.mxu0 %v249_v3  ;;  %v1561_v55 = vld [vmem:[#allocation2 + $0x78] sm:$0xff]   ;;  %v1560_v56 = vld [vmem:[%s2097_s2 + $0x90] sm:$0xff]   ;;  %v1563_v57 = vld [vmem:[#allocation2 + $0x80] sm:$0xff]   ;;  %p1606_p12 = pneg %p1605_p10 }
  0x44   : > { %1359 = vmatprep.subr.bf16.mxu0 %v1531_v7  ;;  %v1562_v58 = vld [vmem:[%s2097_s2 + $0x98] sm:$0xff]   ;;  %v1565_v59 = vld [vmem:[#allocation2 + $0x88] sm:$0xff]   ;;  %v1564_v60 = vld [vmem:[%s2097_s2 + $0xa0] sm:$0xff]   ;;  %p1612_p4 = por %p1611_p3, %p1610_p2 }
  0x45   : > { %1346 = vmatpush3.bf16.msra.mxu1 %v1530_v12  ;;  %v1567_v61 = vld [vmem:[#allocation2 + $0x90] sm:$0xff]   ;;  %v1566_v62 = vld [vmem:[%s2097_s2 + $0xa8] sm:$0xff]   ;;  %v1569_v63 = vld [vmem:[#allocation2 + $0x98] sm:$0xff]  }
  0x46   : > { %1328 = vmatmul.mubr.msk.bf16.vlgmr.msra.gmra.mrb[0].mxu0 %vm268_vm1, %v1524_v6  ;;  %1347 = vmatprep.subr.bf16.mxu1 %v1706_v0  ;;  %v1568_v1 = vld [vmem:[%s2097_s2 + $0xb0] sm:$0xff]   ;;  %v1571_v2 = vld [vmem:[#allocation2 + $0xa0] sm:$0xff]   ;;  %v1570_v3 = vld [vmem:[%s2097_s2 + $0xb8] sm:$0xff]   ;;  %p1613_p7 = pnand %p1612_p4, %p1606_p12 }
  0x47   : > { %1331 = vmatprep.mubr.msk.bf16.mxu0 %vm1707_vm0, %v1706_v0  ;;  %1360 = vmatpush3.bf16.msra.mxu0 %v1531_v7  ;;  %v1572_v4 = vld [vmem:[#allocation2 + $0xa8] sm:$0xff]   ;;  %v1573_v5 = vld [vmem:[#allocation2 + $0xb0] sm:$0xff]   ;;  %v1574_v6 = vld [vmem:[#allocation2 + $0xb8] sm:$0xff]  }
  0x48   : > { %1361 = vmatprep.subr.bf16.mxu0 %v1533_v9 }
  0x49   : > { %1348 = vmatpush3.bf16.msra.mxu1 %v1532_v14 }
  0x4a   : > { %1349 = vmatprep.subr.bf16.mxu1 %v1706_v0 }
  0x4b   : > { %1362 = vmatpush3.bf16.msra.mxu0 %v1533_v9 }
  0x4c   : > { %1363 = vmatprep.subr.bf16.mxu0 %v1535_v11 }
  0x4d   : > { %1350 = vmatpush3.bf16.msra.mxu1 %v1534_v15 }
  0x4e   : > { %1332 = vmatmul.mubr.msk.bf16.gmra.mrb[4].mxu0 %vm268_vm1, %v1525_v10  ;;  %1351 = vmatprep.subr.bf16.mxu1 %v1706_v0 }
  0x4f   : > { %1335 = vmatprep.mubr.msk.bf16.mxu0 %vm1707_vm0, %v1706_v0  ;;  %1364 = vmatpush3.bf16.msra.mxu0 %v1535_v11 }
  0x50   : > { %1365 = vmatprep.subr.bf16.mxu0 %v1537_v13 }
  0x51   : > { %1352 = vmatpush3.bf16.msra.mxu1 %v1536_v17 }
  0x52   : > { %1353 = vmatprep.subr.bf16.mxu1 %v1706_v0 }
  0x53   : > { %1366 = vmatpush3.bf16.msra.mxu0 %v1537_v13 }
  0x54   : > { %1367 = vmatprep.subr.bf16.mxu0 %v1539_v19 }
  0x55   : > { %1354 = vmatpush3.bf16.msra.mxu1 %v1538_v18 }
  0x56   : > { %1336 = vmatmul.mubr.msk.bf16.gmra.mrb[8].mxu0 %vm268_vm1, %v1526_v16  ;;  %1379 = vmatprep.subr.bf16.mxu1 %v1706_v0 }
  0x57   : > { %1368 = vmatpush3.bf16.msra.mxu0 %v1539_v19 }
  0x58   : > { %1369 = vmatprep.subr.bf16.mxu0 %v1541_v20 }
  0x5b   : > { %1370 = vmatpush3.bf16.msra.mxu0 %v1541_v20 }
  0x5c   : > { %1371 = vmatprep.subr.bf16.mxu0 %v1543_v21 }
  0x5f   : > { %1372 = vmatpush3.bf16.msra.mxu0 %v1543_v21 }
  0x60   : > { %1373 = vmatprep.subr.bf16.mxu0 %v1545_v22 }
  0x63   : > { %1374 = vmatpush3.bf16.msra.mxu0 %v1545_v22 }
  0x64   : > { %1399 = vmatprep.subr.bf16.mxu0 %v1547_v23 }
 0x119   : > { %v312_v24 = vpop.f32.mrb[0].mxu0 }
 0x11a   : > { %v1329_v25 = vpop.f32.mrb[1].mxu0 }
 0x11b   : > { %v315_v26 = vpop.f32.mrb[2].mxu0 }
 0x11c   : > { %v1888_v28 = vpack.c.bf16 %v315_v26, %v312_v24  ;;  %v1330_v29 = vpop.f32.mrb[3].mxu0 }
 0x11e   : > { %1356 = vmatmul.mubr.bf16.vlgmr.msra.gmra.mrb[0].mxu1 %v1888_v28 }
 0x11f   : > { %1380 = vmatpush3.bf16.msra.mxu1 %v1540_v27  ;;  %1395 = vmatprep.mubr.msk.bf16.mxu1 %vm1707_vm0, %v1706_v0 }
 0x120   : > { %1381 = vmatprep.subr.bf16.mxu1 %v1706_v0 }
 0x121   : > { %v320_v31 = vpop.f32.mrb[4].mxu0 }
 0x122   : > { %v1333_v32 = vpop.f32.mrb[5].mxu0 }
 0x123   : > { %1382 = vmatpush3.bf16.msra.mxu1 %v1542_v30  ;;  %v323_v33 = vpop.f32.mrb[6].mxu0 }
 0x124   : > { %v1900_v35 = vpack.c.bf16 %v323_v33, %v320_v31  ;;  %v1334_v36 = vpop.f32.mrb[7].mxu0  ;;  %1383 = vmatprep.subr.bf16.mxu1 %v1706_v0 }
 0x126   : > { %1375 = vmatprep.mubr.bf16.mxu0 %v1900_v35 }
 0x127   : > { %1384 = vmatpush3.bf16.msra.mxu1 %v1544_v34 }
 0x128   : > { %1385 = vmatprep.subr.bf16.mxu1 %v1706_v0 }
 0x129   : > { %v328_v38 = vpop.f32.mrb[8].mxu0 }
 0x12a   : > { %v1908_v39 = vpack.c.bf16 %v328_v38, %v328_v38  ;;  %v1337_v40 = vpop.f32.mrb[9].mxu0 }
 0x12b   : > { %1386 = vmatpush3.bf16.msra.mxu1 %v1546_v37  ;;  %v331_v42 = vpop.f32.mrb[10].mxu0 }
 0x12c   : > { %v1338_v44 = vpop.f32.mrb[11].mxu0  ;;  %1376 = vmatmul.mubr.bf16.vlgmr.msra.gmra.mrb[12].mxu0 %v1908_v39  ;;  %1387 = vmatprep.subr.bf16.mxu1 %v1706_v0 }
 0x12d   : > { %1400 = vmatpush3.bf16.msra.mxu0 %v1547_v23  ;;  %1415 = vmatprep.mubr.bf16.mxu0 %v1900_v35 }
 0x12e   : > { %1401 = vmatprep.subr.bf16.mxu0 %v1549_v41 }
 0x12f   : > { %1388 = vmatpush3.bf16.msra.mxu1 %v1548_v43 }
 0x130   : > { %1389 = vmatprep.subr.bf16.mxu1 %v1706_v0 }
 0x131   : > { %1402 = vmatpush3.bf16.msra.mxu0 %v1549_v41 }
 0x132   : > { %1403 = vmatprep.subr.bf16.mxu0 %v1551_v45 }
 0x133   : > { %1390 = vmatpush3.bf16.msra.mxu1 %v1550_v46 }
 0x134   : > { %1391 = vmatprep.subr.bf16.mxu1 %v1706_v0 }
 0x135   : > { %1404 = vmatpush3.bf16.msra.mxu0 %v1551_v45 }
 0x136   : > { %1405 = vmatprep.subr.bf16.mxu0 %v1553_v47 }
 0x137   : > { %1392 = vmatpush3.bf16.msra.mxu1 %v1552_v48 }
 0x138   : > { %1393 = vmatprep.subr.bf16.mxu1 %v1706_v0 }
 0x139   : > { %1406 = vmatpush3.bf16.msra.mxu0 %v1553_v47 }
 0x13a   : > { %1407 = vmatprep.subr.bf16.mxu0 %v1555_v49 }
 0x13b   : > { %1394 = vmatpush3.bf16.msra.mxu1 %v1554_v50 }
 0x13c   : > { %1419 = vmatprep.subr.bf16.mxu1 %v1706_v0 }
 0x13d   : > { %1408 = vmatpush3.bf16.msra.mxu0 %v1555_v49 }
 0x13e   : > { %1396 = vmatmul.mubr.bf16.vlgmr.msra.gmra.mrb[4].mxu1 %v1888_v28  ;;  %1409 = vmatprep.subr.bf16.mxu0 %v1557_v51 }
 0x13f   : > { %1420 = vmatpush3.bf16.msra.mxu1 %v1556_v52  ;;  %1435 = vmatprep.mubr.msk.bf16.mxu1 %vm1707_vm0, %v1706_v0 }
 0x140   : > { %1421 = vmatprep.subr.bf16.mxu1 %v1706_v0 }
 0x141   : > { %1410 = vmatpush3.bf16.msra.mxu0 %v1557_v51 }
 0x142   : > { %1411 = vmatprep.subr.bf16.mxu0 %v1559_v53 }
 0x143   : > { %1422 = vmatpush3.bf16.msra.mxu1 %v1558_v54 }
 0x144   : > { %1423 = vmatprep.subr.bf16.mxu1 %v1706_v0 }
 0x145   : > { %1412 = vmatpush3.bf16.msra.mxu0 %v1559_v53 }
 0x146   : > { %1413 = vmatprep.subr.bf16.mxu0 %v1561_v55 }
 0x147   : > { %1424 = vmatpush3.bf16.msra.mxu1 %v1560_v56 }
 0x148   : > { %1425 = vmatprep.subr.bf16.mxu1 %v1706_v0 }
 0x149   : > { %1414 = vmatpush3.bf16.msra.mxu0 %v1561_v55 }
 0x14a   : > { %1439 = vmatprep.subr.bf16.mxu0 %v1563_v57 }
 0x14b   : > { %1426 = vmatpush3.bf16.msra.mxu1 %v1562_v58 }
 0x14c   : > { %1416 = vmatmul.mubr.bf16.vlgmr.msra.gmra.mrb[16].mxu0 %v1908_v39  ;;  %1427 = vmatprep.subr.bf16.mxu1 %v1706_v0 }
 0x14d   : > { %1440 = vmatpush3.bf16.msra.mxu0 %v1563_v57  ;;  %1455 = vmatprep.mubr.bf16.mxu0 %v1900_v35 }
 0x14e   : > { %1441 = vmatprep.subr.bf16.mxu0 %v1565_v59 }
 0x14f   : > { %1428 = vmatpush3.bf16.msra.mxu1 %v1564_v60 }
 0x150   : > { %1429 = vmatprep.subr.bf16.mxu1 %v1706_v0 }
 0x151   : > { %1442 = vmatpush3.bf16.msra.mxu0 %v1565_v59 }
 0x152   : > { %1443 = vmatprep.subr.bf16.mxu0 %v1567_v61 }
 0x153   : > { %1430 = vmatpush3.bf16.msra.mxu1 %v1566_v62 }
 0x154   : > { %1431 = vmatprep.subr.bf16.mxu1 %v1706_v0 }
 0x155   : > { %1444 = vmatpush3.bf16.msra.mxu0 %v1567_v61 }
 0x156   : > { %1445 = vmatprep.subr.bf16.mxu0 %v1569_v63 }
 0x157   : > { %1432 = vmatpush3.bf16.msra.mxu1 %v1568_v1 }
 0x158   : > { %1433 = vmatprep.subr.bf16.mxu1 %v1706_v0 }
 0x159   : > { %1446 = vmatpush3.bf16.msra.mxu0 %v1569_v63 }
 0x15a   : > { %1447 = vmatprep.subr.bf16.mxu0 %v1571_v2 }
 0x15b   : > { %1434 = vmatpush3.bf16.msra.mxu1 %v1570_v3 }
 0x15d   : > { %1448 = vmatpush3.bf16.msra.mxu0 %v1571_v2 }
 0x15e   : > { %1436 = vmatmul.mubr.bf16.vlgmr.msra.gmra.mrb[8].mxu1 %v1888_v28  ;;  %1449 = vmatprep.subr.bf16.mxu0 %v1572_v4 }
 0x161   : > { %1450 = vmatpush3.bf16.msra.mxu0 %v1572_v4 }
 0x162   : > { %1451 = vmatprep.subr.bf16.mxu0 %v1573_v5 }
 0x165   : > { %1452 = vmatpush3.bf16.msra.mxu0 %v1573_v5 }
 0x166   : > { %1453 = vmatprep.subr.bf16.mxu0 %v1574_v6 }
 0x169   : > { %1454 = vmatpush3.bf16.msra.mxu0 %v1574_v6 }
 0x16c   : > { %1456 = vmatmul.mubr.bf16.vlgmr.msra.gmra.mrb[20].mxu0 %v1908_v39 }
 0x1f1   : > { %v435_v0 = vpop.f32.mrb[0].mxu1 }
 0x1f2   : > { %v436_v7 = vadd.f32 -1.0, %v435_v0  ;;  %v1357_v8 = vpop.f32.mrb[1].mxu1 }
 0x1f3   : > { %v438_v9 = vpop.f32.mrb[2].mxu1 }
 0x1f4   : > { %443 = vst.msk [vmem:[%s1971_s23] sm:$0xff] %vm442_vm2, %v436_v7  ;;  %v439_v10 = vadd.f32 -1.0, %v438_v9  ;;  %v1358_v11 = vpop.f32.mrb[3].mxu1 }
 0x1f6   : > { %444 = vst.msk [vmem:[%s1971_s23 + $0x8] sm:$0xff] %vm442_vm2, %v439_v10 }
 0x1ff   : > { %v1377_v12 = vpop.f32.mrb[12].mxu0 }
 0x200   : > { %v552_v13 = vadd.f32 -1.7922626, %v1377_v12  ;;  %v543_v14 = vpop.f32.mrb[13].mxu0 }
 0x201   : > { %v544_v15 = vadd.f32 -1.7922626, %v543_v14  ;;  %v1378_v16 = vpop.f32.mrb[14].mxu0 }
 0x202   : > { %560 = vst.msk [vmem:[%s1978_s26 + $0x10] sm:$0xff] %vm557_vm3, %v552_v13  ;;  %v546_v17 = vpop.f32.mrb[15].mxu0 }
 0x203   : > { %558 = vst.msk [vmem:[%s1978_s26] sm:$0xff] %vm557_vm3, %v544_v15  ;;  %v547_v18 = vadd.f32 -1.7922626, %v546_v17 }
 0x205   : > { %559 = vst.msk [vmem:[%s1978_s26 + $0x8] sm:$0xff] %vm557_vm3, %v547_v18 }
 0x211   : > { %v660_v19 = vpop.f32.mrb[4].mxu1 }
 0x212   : > { %v661_v20 = vadd.f32 -1.0, %v660_v19  ;;  %v1397_v21 = vpop.f32.mrb[5].mxu1 }
 0x213   : > { %v663_v22 = vpop.f32.mrb[6].mxu1 }
 0x214   : > { %1207 = vst.msk [vmem:[%s1971_s23 + $0x10] sm:$0xff] %vm442_vm2, %v661_v20  ;;  %v664_v23 = vadd.f32 -1.0, %v663_v22  ;;  %v1398_v24 = vpop.f32.mrb[7].mxu1 }
 0x216   : > { %1208 = vst.msk [vmem:[%s1971_s23 + $0x18] sm:$0xff] %vm442_vm2, %v664_v23 }
 0x21f   : > { %v1417_v25 = vpop.f32.mrb[16].mxu0 }
 0x220   : > { %v778_v26 = vadd.f32 -1.7520971, %v1417_v25  ;;  %v769_v27 = vpop.f32.mrb[17].mxu0 }
 0x221   : > { %v770_v28 = vadd.f32 -1.7520971, %v769_v27  ;;  %v1418_v29 = vpop.f32.mrb[18].mxu0 }
 0x222   : > { %1219 = vst.msk [vmem:[%s1978_s26 + $0x28] sm:$0xff] %vm557_vm3, %v778_v26  ;;  %v772_v30 = vpop.f32.mrb[19].mxu0 }
 0x223   : > { %1217 = vst.msk [vmem:[%s1978_s26 + $0x18] sm:$0xff] %vm557_vm3, %v770_v28  ;;  %v773_v31 = vadd.f32 -1.7520971, %v772_v30 }
 0x225   : > { %1218 = vst.msk [vmem:[%s1978_s26 + $0x20] sm:$0xff] %vm557_vm3, %v773_v31 }
 0x231   : > { %v886_v32 = vpop.f32.mrb[8].mxu1 }
 0x232   : > { %v887_v33 = vadd.f32 -1.0, %v886_v32  ;;  %v1437_v34 = vpop.f32.mrb[9].mxu1 }
 0x233   : > { %v889_v35 = vpop.f32.mrb[10].mxu1 }
 0x234   : > { %1244 = vst.msk [vmem:[%s1971_s23 + $0x20] sm:$0xff] %vm442_vm2, %v887_v33  ;;  %v890_v36 = vadd.f32 -1.0, %v889_v35  ;;  %v1438_v37 = vpop.f32.mrb[11].mxu1 }
 0x236   : > { %1245 = vst.msk [vmem:[%s1971_s23 + $0x28] sm:$0xff] %vm442_vm2, %v890_v36 }
 0x237   : > { %1616 = shalt.err (!%p1613_p7)
}
 0x238   : > { %s1617_s15 = scalar_lea.hbm %s2003_s9, 768  ;;  %s1621_s25 = scalar_lea.hbm %s2099_s4, 1536 }
 0x239   : > { %p1618_p8 = scmp.ne.s32.totalorder %s2003_s9, %s1617_s15  ;;  %p1622_p1 = scmp.lt.u32.totalorder %s2003_s9, %s2099_s4 }
 0x23a   : > { %p1623_p0 = scmp.lt.u32.totalorder %s1621_s25, %s1617_s15  ;;  %p1625_p6 = scmp.lt.u32.totalorder %s1617_s15, %s2003_s9 }
 0x23b   : > { %p1619_p11 = pnand %p1618_p8, %p2111_p9 }
 0x23c   : > { %p1624_p5 = por %p1623_p0, %p1622_p1 }
 0x23d   : > { %p1620_p13 = pneg %p1619_p11 }
 0x23e   : > { %p1626_p10 = por %p1625_p6, %p1624_p5 }
 0x240   : > { %p1627_p12 = pnand %p1626_p10, %p1620_p13 }
 0x242   : > { %1630 = shalt.err (!%p1627_p12)
}
 0x243   : > { %s1709_s8 = smov 128   ;;  %s1710_s11 = smov 8   ;;  %v1457_v38 = vpop.f32.mrb[20].mxu0 }
 0x244   : > { %1467 = dma.vmem_to_hbm [thread:$0]  (%p2111_p9), %s1998_s30, 768, %s2003_s9, %s1014_s10, %s1709_s8, %s1709_s8, %s1710_s11   ;;  %v1004_v39 = vadd.f32 -1.4802198, %v1457_v38  ;;  %v995_v40 = vpop.f32.mrb[21].mxu0 }
 0x245   : > { %s1462_s12 = smul.u32 1152, %s1763_s22  ;;  %s1048_s13 = sshll.u32 %s1978_s26, 4  ;;  %v996_v41 = vadd.f32 -1.4802198, %v995_v40  ;;  %v1458_v42 = vpop.f32.mrb[22].mxu0  ;;  %s2040_s13 = int_to_ptr.vmem [resolvable:$true] %s1048_s13 }
 0x246   : > { %1256 = vst.msk [vmem:[%s1978_s26 + $0x40] sm:$0xff] %vm557_vm3, %v1004_v39  ;;  %v998_v43 = vpop.f32.mrb[23].mxu0  ;;  %s1019_s10 = scalar_lea.sflag [#allocation7], %s1968_s16  ;;  %s1631_s14 = scalar_lea.vmem %s2040_s13, 1152 }
 0x247   : > { %1254 = vst.msk [vmem:[%s1978_s26 + $0x30] sm:$0xff] %vm557_vm3, %v996_v41  ;;  %v999_v44 = vadd.f32 -1.4802198, %v998_v43  ;;  %s2047_s22 = scalar_lea.hbm %s2100_s5, %s1462_s12  ;;  %p1632_p2 = scmp.ne.s32.totalorder %s2040_s13, %s1631_s14 }
 0x248   : > { %s1711_s15 = smov [#allocation6]  }
 0x249   : > { %1255 = vst.msk [vmem:[%s1978_s26 + $0x38] sm:$0xff] %vm557_vm3, %v999_v44  ;;  %p1633_p3 = pnand %p1632_p2, %p2111_p9  ;;  %s1635_s17 = sshll.u32 %s1711_s15, 4  ;;  %s1636_s17 = int_to_ptr.vmem [resolvable:$false] %s1635_s17 }
 0x24a   : > { %s1637_s23 = scalar_lea.vmem %s1636_s17, 2304  ;;  %p1638_p7 = scmp.lt.s32.totalorder %s2040_s13, %s1636_s17 }
 0x24b   : > { %p1634_p4 = pneg %p1633_p3  ;;  %p1639_p8 = scmp.lt.s32.totalorder %s1637_s23, %s1631_s14 }
 0x24d   : > { %p1640_p11 = por %p1639_p8, %p1638_p7 }
 0x24f   : > { %p1641_p13 = pnand %p1640_p11, %p1634_p4 }
 0x251   : > { %1644 = shalt.err (!%p1641_p13)
}
 0x252   : > { %s1645_s26 = scalar_lea.hbm %s2047_s22, 1152  ;;  %s1649_s7 = scalar_lea.hbm %s2100_s5, 2304 }
 0x253   : > { %p1646_p1 = scmp.ne.s32.totalorder %s2047_s22, %s1645_s26  ;;  %p1650_p6 = scmp.lt.u32.totalorder %s2047_s22, %s2100_s5 }
 0x254   : > { %p1651_p10 = scmp.lt.u32.totalorder %s1649_s7, %s1645_s26  ;;  %p1653_p2 = scmp.lt.u32.totalorder %s1645_s26, %s2047_s22 }
 0x255   : > { %p1647_p0 = pnand %p1646_p1, %p2111_p9 }
 0x256   : > { %p1652_p12 = por %p1651_p10, %p1650_p6 }
 0x257   : > { %p1648_p5 = pneg %p1647_p0 }
 0x258   : > { %p1654_p3 = por %p1653_p2, %p1652_p12 }
 0x25a   : > { %p1655_p4 = pnand %p1654_p3, %p1648_p5 }
 0x25c   : > { %1658 = shalt.err (!%p1655_p4)
}
 0x25d   : > { %1468 = dma.vmem_to_hbm [thread:$0]  (%p2111_p9), %s2040_s13, 1152, %s2047_s22, %s1019_s10, %s1709_s8, %s1709_s8, %s1710_s11  }
 0x25e PF: > { %p1484_p7 = scmp.ge.s32.totalorder %s1701_s21, 2  ;;  %s1063_s9 = sand.u32 1, %s1689_s18  }
 0x25f   : > { %p2112_p8 = scmp.ne.s32.totalorder %s2105_s29, 0  ;;  %s1064_s14 = scalar_lea.sflag [#allocation4], %s1063_s9 }
 0x261   : > { %p1476_p11 = pnand %p1484_p7, %p2112_p8 }
 0x263   : > { %1680 = dma.done.wait (!%p1476_p11), %s1064_s14, 768  }
 0x264   : > { %1682 = vsyncadd (!%p1476_p11), %s1064_s14, 4294966528  ;;  %s1073_s28 = scalar_lea.sflag [#allocation7], %s1063_s9 }
 0x265   : > { %1684 = dma.done.wait (!%p1476_p11), %s1073_s28, 1152  }
 0x266   : > { %1686 = vsyncadd (!%p1476_p11), %s1073_s28, 4294966144  ;;  %p20_p9 = scmp.ge.s32.totalorder %s1767_s24, 4   ;;  %s2113_s18 = smov %s1693_s19 }
 0x267   : > { %s2114_s19 = smov %s1697_s20  ;;  %s2115_s20 = smov %s1778_s27 }
 0x268   : > { %s2116_s21 = smov %s1767_s24  ;;  %22 = sbr.rel (!%p20_p9) target bundleno = 6 (0x6), region = 101 }
 0x26f   :  { %1078 = vsyncpa [#allocation3], 1 }
 0x270   :  { %1080 = vsyncpa [#allocation3 + $0x1], 1 }
 0x271   :  { %1081 = vsyncpa [#allocation4], 1 }
 0x272   :  { %1083 = vsyncpa [#allocation4 + $0x1], 1 }
 0x273   :  { %1084 = vsyncpa [#allocation7], 1 }
 0x274   :  { %1086 = vsyncpa [#allocation7 + $0x1], 1 }

</bundles_post_ra>
